<compile_context>
chip_gen: v5e
topology: v5e:2x2
jax: 0.10.0
libtpu: 0.0.40
codegen_flags: <defaults>
</compile_context>

<pallas_src>
import functools

import jax
import jax.numpy as jnp
from jax import lax
from jax.experimental import pallas as pl
from jax.experimental.pallas import tpu as pltpu

LEAKY_SLOPE = 0.2
POE_EPS = 1e-8
LANE = 128
SUBLANE = 8


def _round_up(x, m):
    return (x + m - 1) // m * m


# ---------------------------------------------------------------------------
# Fused MVAE forward kernel: encoders -> PoE(+prior) -> reparam -> decoders
# ---------------------------------------------------------------------------
def _mvae_fused_kernel(*refs, n_mod, n_enc, n_dec, pad_e):
    """Single-launch fused forward.  All refs are full (padded) VMEM tiles.

    Flat ref layout (inputs then outputs):
      inputs : x_0..x_{n-1},
               per-mod encoder: [w, b]*n_enc[i], head_w, head_b,
               per-mod decoder: [w, b]*n_dec[i], out_w, out_b,
               eps
      outputs: dec_0..dec_{n-1}, pd_mu, pd_logvar
    """
    idx = 0

    def take():
        nonlocal idx
        r = refs[idx]
        idx += 1
        return r

    x_refs = [take() for _ in range(n_mod)]
    enc_params = []
    for i in range(n_mod):
        layers = [(take(), take()) for _ in range(n_enc[i])]
        head = (take(), take())  # merged [fc_mu | fc_sg]
        enc_params.append((layers, head))
    dec_params = []
    for i in range(n_mod):
        layers = [(take(), take()) for _ in range(n_dec[i])]
        fc_out = (take(), take())
        dec_params.append((layers, fc_out))
    eps_ref = take()
    dec_out_refs = [take() for _ in range(n_mod)]
    pd_mu_ref = take()
    pd_lv_ref = take()

    def linear(h, w_ref, b_ref, leaky):
        y = jnp.dot(h, w_ref[...], preferred_element_type=jnp.float32)
        y = y + b_ref[...]
        if leaky:
            y = jnp.where(y >= 0.0, y, LEAKY_SLOPE * y)
        return y

    # ----- encoders + product-of-experts (prior expert folded analytically) --
    bsz = x_refs[0].shape[0]
    prior_t = 1.0 / (1.0 + POE_EPS)  # prior: mu = 0, logvar = 0
    sum_t = jnp.full((bsz, pad_e), prior_t, jnp.float32)
    w_mu = jnp.zeros((bsz, pad_e), jnp.float32)
    for i in range(n_mod):
        layers, (wh_ref, bh_ref) = enc_params[i]
        h = x_refs[i][...]
        for (w_ref, b_ref) in layers:
            h = linear(h, w_ref, b_ref, leaky=True)
        head = linear(h, wh_ref, bh_ref, leaky=False)  # (B, 2*pad_e)
        mu = head[:, :pad_e]
        lv = head[:, pad_e:]
        t = 1.0 / (jnp.exp(lv) + POE_EPS)
        sum_t = sum_t + t
        w_mu = w_mu + mu * t

    pd_mu = w_mu / sum_t
    pd_lv = -jnp.log(sum_t)        # == log(1 / sum_t)
    std = lax.rsqrt(sum_t)         # == exp(0.5 * pd_lv)
    z = pd_mu + eps_ref[...] * std

    pd_mu_ref[...] = pd_mu
    pd_lv_ref[...] = pd_lv

    # ----- decoders -----------------------------------------------------------
    for i in range(n_mod):
        layers, (wo_ref, bo_ref) = dec_params[i]
        h = z
        for (w_ref, b_ref) in layers:
            h = linear(h, w_ref, b_ref, leaky=True)
        dec_out_refs[i][...] = linear(h, wo_ref, bo_ref, leaky=False)


# ---------------------------------------------------------------------------
# Deterministic parameter construction (glue, plain JAX)
# ---------------------------------------------------------------------------
def _weight_norm_linear_params(key, in_f, out_f):
    kv, kg, kb = jax.random.split(key, 3)
    v = jax.random.normal(kv, (out_f, in_f), jnp.float32) / jnp.sqrt(float(in_f))
    g = 1.0 + 0.1 * jax.random.normal(kg, (out_f,), jnp.float32)
    b = 0.1 * jax.random.normal(kb, (out_f,), jnp.float32)
    # weight_norm (dim=0 default): W = g * v / ||v|| over the input dim per row.
    w = g[:, None] * v / jnp.linalg.norm(v, axis=1, keepdims=True)
    return w.T, b  # stored as (in, out)


def _linear_params(key, in_f, out_f):
    kw, kb = jax.random.split(key)
    w = jax.random.normal(kw, (out_f, in_f), jnp.float32) / jnp.sqrt(float(in_f))
    b = 0.1 * jax.random.normal(kb, (out_f,), jnp.float32)
    return w.T, b


def build_mvae_params(key, input_shapes, encoded_size, archs):
    """Unpadded params mirroring the PyTorch module structure."""
    params = {"enc": [], "dec": []}
    for inp_sh, arch in zip(input_shapes, archs):
        key, *ks = jax.random.split(key, 2 * len(arch) + 6)
        ks = iter(ks)
        layers, inputs = [], inp_sh
        for arc in arch:
            layers.append(_weight_norm_linear_params(next(ks), inputs, arc))
            inputs = arc
        fc_mu = _linear_params(next(ks), arch[-1], encoded_size)
        fc_sg = _linear_params(next(ks), arch[-1], encoded_size)
        params["enc"].append({"layers": layers, "fc_mu": fc_mu, "fc_sg": fc_sg})
        layers, inputs = [], encoded_size
        for arc in reversed(arch):
            layers.append(_weight_norm_linear_params(next(ks), inputs, arc))
            inputs = arc
        fc_out = _linear_params(next(ks), arch[0], inp_sh)
        params["dec"].append({"layers": layers, "fc_out": fc_out})
    return params


def pad_mvae_params(params, input_shapes, encoded_size, archs):
    """Zero-pad every feature dim to a multiple of 128 lanes and merge the
    mu/logvar heads.  Zero padding is mathematically exact (padded inputs,
    padded weight rows/cols and padded biases are all zero)."""
    pad_e = _round_up(encoded_size, LANE)

    def pad_wb(w, b, in_pad, out_pad):
        wp = jnp.zeros((in_pad, out_pad), jnp.float32)
        wp = wp.at[: w.shape[0], : w.shape[1]].set(w)
        bp = jnp.zeros((1, out_pad), jnp.float32)
        bp = bp.at[0, : b.shape[0]].set(b)
        return wp, bp

    padded = {
        "n_mod": len(input_shapes),
        "encoded_size": encoded_size,
        "pad_e": pad_e,
        "input_shapes": tuple(input_shapes),
        "in_pads": tuple(_round_up(s, LANE) for s in input_shapes),
        "n_enc": tuple(len(a) for a in archs),
        "n_dec": tuple(len(a) for a in archs),
        "enc": [],
        "dec": [],
    }

    for i, (inp_sh, arch) in enumerate(zip(input_shapes, archs)):
        enc = params["enc"][i]
        dims = [inp_sh] + list(arch)
        layers = []
        for li, (w, b) in enumerate(enc["layers"]):
            layers.append(
                pad_wb(w, b, _round_up(dims[li], LANE), _round_up(dims[li + 1], LANE))
            )
        # merged head: [fc_mu | fc_sg] along the output dim (lane-dense 2*128)
        in_pad = _round_up(arch[-1], LANE)
        wmu_p, bmu_p = pad_wb(*enc["fc_mu"], in_pad, pad_e)
        wsg_p, bsg_p = pad_wb(*enc["fc_sg"], in_pad, pad_e)
        head_w = jnp.concatenate([wmu_p, wsg_p], axis=1)
        head_b = jnp.concatenate([bmu_p, bsg_p], axis=1)
        padded["enc"].append({"layers": layers, "head_w": head_w, "head_b": head_b})

        dec = params["dec"][i]
        ddims = [encoded_size] + list(reversed(arch))
        layers = []
        for li, (w, b) in enumerate(dec["layers"]):
            layers.append(
                pad_wb(w, b, _round_up(ddims[li], LANE), _round_up(ddims[li + 1], LANE))
            )
        out_w, out_b = pad_wb(
            *dec["fc_out"], _round_up(arch[0], LANE), _round_up(inp_sh, LANE)
        )
        padded["dec"].append({"layers": layers, "out_w": out_w, "out_b": out_b})
    return padded


# ---------------------------------------------------------------------------
# MVAE forward (matches MVAE.forward: infer -> reparametrize -> decode)
# ---------------------------------------------------------------------------
def mvae_forward(padded, xs, rng_key):
    n_mod = padded["n_mod"]
    enc_size = padded["encoded_size"]
    pad_e = padded["pad_e"]
    batch = xs[0].shape[0]
    b_pad = _round_up(max(batch, SUBLANE), SUBLANE)

    # zero-pad inputs to (b_pad, 128k) lane-dense tiles
    x_pads = []
    for x, d_pad in zip(xs, padded["in_pads"]):
        xp = jnp.zeros((b_pad, d_pad), jnp.float32)
        x_pads.append(xp.at[:batch, : x.shape[1]].set(x))

    # torch.randn_like noise -> deterministic jax.random noise fed to the kernel
    eps = jax.random.normal(rng_key, (batch, enc_size), jnp.float32)
    eps_pad = jnp.zeros((b_pad, pad_e), jnp.float32).at[:batch, :enc_size].set(eps)

    flat_inputs = list(x_pads)
    for enc in padded["enc"]:
        for w, b in enc["layers"]:
            flat_inputs += [w, b]
        flat_inputs += [enc["head_w"], enc["head_b"]]
    for dec in padded["dec"]:
        for w, b in dec["layers"]:
            flat_inputs += [w, b]
        flat_inputs += [dec["out_w"], dec["out_b"]]
    flat_inputs.append(eps_pad)

    out_shapes = tuple(
        [jax.ShapeDtypeStruct((b_pad, d), jnp.float32) for d in padded["in_pads"]]
        + [jax.ShapeDtypeStruct((b_pad, pad_e), jnp.float32)] * 2
    )

    kernel = functools.partial(
        _mvae_fused_kernel,
        n_mod=n_mod,
        n_enc=padded["n_enc"],
        n_dec=padded["n_dec"],
        pad_e=pad_e,
    )

    # Everything (weights + activations) is ~1 MiB padded, so a single
    # full-array VMEM tile per ref with a trivial grid is the right structure.
    # TODO(synk): for non-toy layer sizes, switch to a tiled
    # (M//tm, N//tn, K//tk) grid with f32 accumulators and bf16 MXU inputs.
    outs = pl.pallas_call(
        kernel,
        out_shape=out_shapes,
        grid=(1,),
        in_specs=[pl.BlockSpec(a.shape, lambda i: (0, 0)) for a in flat_inputs],
        out_specs=tuple(pl.BlockSpec(s.shape, lambda i: (0, 0)) for s in out_shapes),
        compiler_params=pltpu.CompilerParams(dimension_semantics=("arbitrary",)),
    )(*flat_inputs)

    dec_pad = outs[:n_mod]
    pd_mu_pad, pd_lv_pad = outs[n_mod], outs[n_mod + 1]
    decoded = [d[:batch, :sh] for d, sh in zip(dec_pad, padded["input_shapes"])]
    pd_mu = pd_mu_pad[:batch, :enc_size]
    pd_logvar = pd_lv_pad[:batch, :enc_size]
    return decoded, pd_mu, pd_logvar


# ---------------------------------------------------------------------------
# Pure-JAX reference (for a quick numerical check against unpadded params)
# ---------------------------------------------------------------------------
def _ref_forward(params, xs, encoded_size, rng_key):
    def lin(x, w, b, leaky):
        y = x @ w + b
        return jnp.where(y >= 0.0, y, LEAKY_SLOPE * y) if leaky else y

    batch = xs[0].shape[0]
    mus = [jnp.zeros((1, batch, encoded_size), jnp.float32)]
    lvs = [jnp.zeros((1, batch, encoded_size), jnp.float32)]
    for i, x in enumerate(xs):
        enc = params["enc"][i]
        h = x
        for w, b in enc["layers"]:
            h = lin(h, w, b, True)
        mus.append(lin(h, *enc["fc_mu"], False)[None])
        lvs.append(lin(h, *enc["fc_sg"], False)[None])
    mu_all = jnp.concatenate(mus, 0)
    lv_all = jnp.concatenate(lvs, 0)
    var = jnp.exp(lv_all) + POE_EPS
    T = 1.0 / var
    pd_mu = jnp.sum(mu_all * T, 0) / jnp.sum(T, 0)
    pd_lv = jnp.log(1.0 / jnp.sum(T, 0))
    eps = jax.random.normal(rng_key, (batch, encoded_size), jnp.float32)
    z = pd_mu + eps * jnp.exp(0.5 * pd_lv)
    decoded = []
    for i in range(len(xs)):
        dec = params["dec"][i]
        h = z
        for w, b in dec["layers"]:
            h = lin(h, w, b, True)
        decoded.append(lin(h, *dec["fc_out"], False))
    return decoded, pd_mu, pd_lv


# ---------------------------------------------------------------------------
if __name__ == "__main__":
    # Small config consistent with MVAE(__init__): two modalities.
    input_shapes = (16, 12)
    encoded_size = 8
    archs = ((32, 16), (24, 16))
    batch = 8

    root = jax.random.PRNGKey(0)
    k_params, k_x1, k_x2, k_eps = jax.random.split(root, 4)

    params = build_mvae_params(k_params, input_shapes, encoded_size, archs)
    padded = pad_mvae_params(params, input_shapes, encoded_size, archs)

    x1 = jax.random.normal(k_x1, (batch, input_shapes[0]), jnp.float32)
    x2 = jax.random.normal(k_x2, (batch, input_shapes[1]), jnp.float32)
    xs = [x1, x2]

    decoded, mu, logvar = mvae_forward(padded, xs, k_eps)
    jax.block_until_ready((decoded, mu, logvar))

    # quick correctness check against a pure-JAX reference (unpadded params)
    dec_ref, mu_ref, lv_ref = _ref_forward(params, xs, encoded_size, k_eps)
    assert all(
        bool(jnp.allclose(a, b, atol=1e-4, rtol=1e-4))
        for a, b in zip(decoded, dec_ref)
    )
    assert bool(jnp.allclose(mu, mu_ref, atol=1e-4, rtol=1e-4))
    assert bool(jnp.allclose(logvar, lv_ref, atol=1e-4, rtol=1e-4))

    print("KERNEL_OK")
</pallas_src>

<mosaic_0001>
module attributes {stable_mosaic.version = 11 : i64} {
  func.func @_mvae_fused_kernel(%arg0: i32, %arg1: memref<8x128xf32, #tpu.memory_space<vmem>>, %arg2: memref<8x128xf32, #tpu.memory_space<vmem>>, %arg3: memref<128x128xf32, #tpu.memory_space<vmem>>, %arg4: memref<1x128xf32, #tpu.memory_space<vmem>>, %arg5: memref<128x128xf32, #tpu.memory_space<vmem>>, %arg6: memref<1x128xf32, #tpu.memory_space<vmem>>, %arg7: memref<128x256xf32, #tpu.memory_space<vmem>>, %arg8: memref<1x256xf32, #tpu.memory_space<vmem>>, %arg9: memref<128x128xf32, #tpu.memory_space<vmem>>, %arg10: memref<1x128xf32, #tpu.memory_space<vmem>>, %arg11: memref<128x128xf32, #tpu.memory_space<vmem>>, %arg12: memref<1x128xf32, #tpu.memory_space<vmem>>, %arg13: memref<128x256xf32, #tpu.memory_space<vmem>>, %arg14: memref<1x256xf32, #tpu.memory_space<vmem>>, %arg15: memref<128x128xf32, #tpu.memory_space<vmem>>, %arg16: memref<1x128xf32, #tpu.memory_space<vmem>>, %arg17: memref<128x128xf32, #tpu.memory_space<vmem>>, %arg18: memref<1x128xf32, #tpu.memory_space<vmem>>, %arg19: memref<128x128xf32, #tpu.memory_space<vmem>>, %arg20: memref<1x128xf32, #tpu.memory_space<vmem>>, %arg21: memref<128x128xf32, #tpu.memory_space<vmem>>, %arg22: memref<1x128xf32, #tpu.memory_space<vmem>>, %arg23: memref<128x128xf32, #tpu.memory_space<vmem>>, %arg24: memref<1x128xf32, #tpu.memory_space<vmem>>, %arg25: memref<128x128xf32, #tpu.memory_space<vmem>>, %arg26: memref<1x128xf32, #tpu.memory_space<vmem>>, %arg27: memref<8x128xf32, #tpu.memory_space<vmem>>, %arg28: memref<8x128xf32, #tpu.memory_space<vmem>>, %arg29: memref<8x128xf32, #tpu.memory_space<vmem>>, %arg30: memref<8x128xf32, #tpu.memory_space<vmem>>, %arg31: memref<8x128xf32, #tpu.memory_space<vmem>>) attributes {dimension_semantics = [#tpu.dimension_semantics<arbitrary>], iteration_bounds = array<i64: 1>, scalar_prefetch = 0 : i64, scratch_operands = 0 : i64, tpu.core_type = #tpu.core_type<tc>, window_params = [{pipeline_mode = #tpu.pipeline_mode<synchronous>, transform_indices = @transform_0, window_bounds = array<i64: 8, 128>}, {pipeline_mode = #tpu.pipeline_mode<synchronous>, transform_indices = @transform_1, window_bounds = array<i64: 8, 128>}, {pipeline_mode = #tpu.pipeline_mode<synchronous>, transform_indices = @transform_2, window_bounds = array<i64: 128, 128>}, {pipeline_mode = #tpu.pipeline_mode<synchronous>, transform_indices = @transform_3, window_bounds = array<i64: 1, 128>}, {pipeline_mode = #tpu.pipeline_mode<synchronous>, transform_indices = @transform_4, window_bounds = array<i64: 128, 128>}, {pipeline_mode = #tpu.pipeline_mode<synchronous>, transform_indices = @transform_5, window_bounds = array<i64: 1, 128>}, {pipeline_mode = #tpu.pipeline_mode<synchronous>, transform_indices = @transform_6, window_bounds = array<i64: 128, 256>}, {pipeline_mode = #tpu.pipeline_mode<synchronous>, transform_indices = @transform_7, window_bounds = array<i64: 1, 256>}, {pipeline_mode = #tpu.pipeline_mode<synchronous>, transform_indices = @transform_8, window_bounds = array<i64: 128, 128>}, {pipeline_mode = #tpu.pipeline_mode<synchronous>, transform_indices = @transform_9, window_bounds = array<i64: 1, 128>}, {pipeline_mode = #tpu.pipeline_mode<synchronous>, transform_indices = @transform_10, window_bounds = array<i64: 128, 128>}, {pipeline_mode = #tpu.pipeline_mode<synchronous>, transform_indices = @transform_11, window_bounds = array<i64: 1, 128>}, {pipeline_mode = #tpu.pipeline_mode<synchronous>, transform_indices = @transform_12, window_bounds = array<i64: 128, 256>}, {pipeline_mode = #tpu.pipeline_mode<synchronous>, transform_indices = @transform_13, window_bounds = array<i64: 1, 256>}, {pipeline_mode = #tpu.pipeline_mode<synchronous>, transform_indices = @transform_14, window_bounds = array<i64: 128, 128>}, {pipeline_mode = #tpu.pipeline_mode<synchronous>, transform_indices = @transform_15, window_bounds = array<i64: 1, 128>}, {pipeline_mode = #tpu.pipeline_mode<synchronous>, transform_indices = @transform_16, window_bounds = array<i64: 128, 128>}, {pipeline_mode = #tpu.pipeline_mode<synchronous>, transform_indices = @transform_17, window_bounds = array<i64: 1, 128>}, {pipeline_mode = #tpu.pipeline_mode<synchronous>, transform_indices = @transform_18, window_bounds = array<i64: 128, 128>}, {pipeline_mode = #tpu.pipeline_mode<synchronous>, transform_indices = @transform_19, window_bounds = array<i64: 1, 128>}, {pipeline_mode = #tpu.pipeline_mode<synchronous>, transform_indices = @transform_20, window_bounds = array<i64: 128, 128>}, {pipeline_mode = #tpu.pipeline_mode<synchronous>, transform_indices = @transform_21, window_bounds = array<i64: 1, 128>}, {pipeline_mode = #tpu.pipeline_mode<synchronous>, transform_indices = @transform_22, window_bounds = array<i64: 128, 128>}, {pipeline_mode = #tpu.pipeline_mode<synchronous>, transform_indices = @transform_23, window_bounds = array<i64: 1, 128>}, {pipeline_mode = #tpu.pipeline_mode<synchronous>, transform_indices = @transform_24, window_bounds = array<i64: 128, 128>}, {pipeline_mode = #tpu.pipeline_mode<synchronous>, transform_indices = @transform_25, window_bounds = array<i64: 1, 128>}, {pipeline_mode = #tpu.pipeline_mode<synchronous>, transform_indices = @transform_26, window_bounds = array<i64: 8, 128>}, {pipeline_mode = #tpu.pipeline_mode<synchronous>, transform_indices = @transform_27, window_bounds = array<i64: 8, 128>}, {pipeline_mode = #tpu.pipeline_mode<synchronous>, transform_indices = @transform_28, window_bounds = array<i64: 8, 128>}, {pipeline_mode = #tpu.pipeline_mode<synchronous>, transform_indices = @transform_29, window_bounds = array<i64: 8, 128>}, {pipeline_mode = #tpu.pipeline_mode<synchronous>, transform_indices = @transform_30, window_bounds = array<i64: 8, 128>}]} {
    %cst = arith.constant 1.000000e+00 : f32
    %0 = vector.broadcast %cst : f32 to vector<8x128xf32>
    %cst_0 = arith.constant 0.000000e+00 : f32
    %1 = vector.broadcast %cst_0 : f32 to vector<8x128xf32>
    %c0 = arith.constant 0 : index
    %c0_1 = arith.constant 0 : index
    %2 = vector.load %arg1[%c0, %c0_1] : memref<8x128xf32, #tpu.memory_space<vmem>>, vector<8x128xf32>
    %c0_2 = arith.constant 0 : index
    %c0_3 = arith.constant 0 : index
    %3 = vector.load %arg3[%c0_2, %c0_3] : memref<128x128xf32, #tpu.memory_space<vmem>>, vector<128x128xf32>
    %cst_4 = arith.constant dense<0.000000e+00> : vector<8x128xf32>
    %4 = tpu.matmul %2, %3, %cst_4 {dimension_numbers = #tpu.dot_dimension_numbers<[1], [0], [0], [1], [0, 0, 1, 1], [], []>} : vector<8x128xf32>, vector<128x128xf32>, vector<8x128xf32> -> vector<8x128xf32>
    %c0_5 = arith.constant 0 : index
    %c0_6 = arith.constant 0 : index
    %5 = vector.load %arg4[%c0_5, %c0_6] : memref<1x128xf32, #tpu.memory_space<vmem>>, vector<1x128xf32>
    %6 = vector.broadcast %5 : vector<1x128xf32> to vector<8x128xf32>
    %7 = arith.addf %4, %6 : vector<8x128xf32>
    %cst_7 = arith.constant 0.000000e+00 : f32
    %8 = vector.broadcast %cst_7 : f32 to vector<8x128xf32>
    %9 = arith.cmpf oge, %7, %8 : vector<8x128xf32>
    %cst_8 = arith.constant 2.000000e-01 : f32
    %10 = vector.broadcast %cst_8 : f32 to vector<8x128xf32>
    %11 = arith.mulf %10, %7 : vector<8x128xf32>
    %12 = arith.select %9, %7, %11 : vector<8x128xi1>, vector<8x128xf32>
    %c0_9 = arith.constant 0 : index
    %c0_10 = arith.constant 0 : index
    %13 = vector.load %arg5[%c0_9, %c0_10] : memref<128x128xf32, #tpu.memory_space<vmem>>, vector<128x128xf32>
    %cst_11 = arith.constant dense<0.000000e+00> : vector<8x128xf32>
    %14 = tpu.matmul %12, %13, %cst_11 {dimension_numbers = #tpu.dot_dimension_numbers<[1], [0], [0], [1], [0, 0, 1, 1], [], []>} : vector<8x128xf32>, vector<128x128xf32>, vector<8x128xf32> -> vector<8x128xf32>
    %c0_12 = arith.constant 0 : index
    %c0_13 = arith.constant 0 : index
    %15 = vector.load %arg6[%c0_12, %c0_13] : memref<1x128xf32, #tpu.memory_space<vmem>>, vector<1x128xf32>
    %16 = vector.broadcast %15 : vector<1x128xf32> to vector<8x128xf32>
    %17 = arith.addf %14, %16 : vector<8x128xf32>
    %cst_14 = arith.constant 0.000000e+00 : f32
    %18 = vector.broadcast %cst_14 : f32 to vector<8x128xf32>
    %19 = arith.cmpf oge, %17, %18 : vector<8x128xf32>
    %cst_15 = arith.constant 2.000000e-01 : f32
    %20 = vector.broadcast %cst_15 : f32 to vector<8x128xf32>
    %21 = arith.mulf %20, %17 : vector<8x128xf32>
    %22 = arith.select %19, %17, %21 : vector<8x128xi1>, vector<8x128xf32>
    %c0_16 = arith.constant 0 : index
    %c0_17 = arith.constant 0 : index
    %23 = vector.load %arg7[%c0_16, %c0_17] : memref<128x256xf32, #tpu.memory_space<vmem>>, vector<128x256xf32>
    %cst_18 = arith.constant dense<0.000000e+00> : vector<8x256xf32>
    %24 = tpu.matmul %22, %23, %cst_18 {dimension_numbers = #tpu.dot_dimension_numbers<[1], [0], [0], [1], [0, 0, 1, 1], [], []>} : vector<8x128xf32>, vector<128x256xf32>, vector<8x256xf32> -> vector<8x256xf32>
    %c0_19 = arith.constant 0 : index
    %c0_20 = arith.constant 0 : index
    %25 = vector.load %arg8[%c0_19, %c0_20] : memref<1x256xf32, #tpu.memory_space<vmem>>, vector<1x256xf32>
    %26 = vector.broadcast %25 : vector<1x256xf32> to vector<8x256xf32>
    %27 = arith.addf %24, %26 : vector<8x256xf32>
    %28 = vector.extract_strided_slice %27 {offsets = [0, 0], sizes = [8, 128], strides = [1, 1]} : vector<8x256xf32> to vector<8x128xf32>
    %29 = vector.extract_strided_slice %27 {offsets = [0, 128], sizes = [8, 128], strides = [1, 1]} : vector<8x256xf32> to vector<8x128xf32>
    %30 = math.exp %29 : vector<8x128xf32>
    %cst_21 = arith.constant 9.99999993E-9 : f32
    %31 = vector.broadcast %cst_21 : f32 to vector<8x128xf32>
    %32 = arith.addf %30, %31 : vector<8x128xf32>
    %cst_22 = arith.constant 1.000000e+00 : f32
    %33 = vector.broadcast %cst_22 : f32 to vector<8x128xf32>
    %34 = arith.divf %33, %32 : vector<8x128xf32>
    %35 = arith.addf %0, %34 : vector<8x128xf32>
    %36 = arith.mulf %28, %34 : vector<8x128xf32>
    %37 = arith.addf %1, %36 : vector<8x128xf32>
    %c0_23 = arith.constant 0 : index
    %c0_24 = arith.constant 0 : index
    %38 = vector.load %arg2[%c0_23, %c0_24] : memref<8x128xf32, #tpu.memory_space<vmem>>, vector<8x128xf32>
    %c0_25 = arith.constant 0 : index
    %c0_26 = arith.constant 0 : index
    %39 = vector.load %arg9[%c0_25, %c0_26] : memref<128x128xf32, #tpu.memory_space<vmem>>, vector<128x128xf32>
    %cst_27 = arith.constant dense<0.000000e+00> : vector<8x128xf32>
    %40 = tpu.matmul %38, %39, %cst_27 {dimension_numbers = #tpu.dot_dimension_numbers<[1], [0], [0], [1], [0, 0, 1, 1], [], []>} : vector<8x128xf32>, vector<128x128xf32>, vector<8x128xf32> -> vector<8x128xf32>
    %c0_28 = arith.constant 0 : index
    %c0_29 = arith.constant 0 : index
    %41 = vector.load %arg10[%c0_28, %c0_29] : memref<1x128xf32, #tpu.memory_space<vmem>>, vector<1x128xf32>
    %42 = vector.broadcast %41 : vector<1x128xf32> to vector<8x128xf32>
    %43 = arith.addf %40, %42 : vector<8x128xf32>
    %cst_30 = arith.constant 0.000000e+00 : f32
    %44 = vector.broadcast %cst_30 : f32 to vector<8x128xf32>
    %45 = arith.cmpf oge, %43, %44 : vector<8x128xf32>
    %cst_31 = arith.constant 2.000000e-01 : f32
    %46 = vector.broadcast %cst_31 : f32 to vector<8x128xf32>
    %47 = arith.mulf %46, %43 : vector<8x128xf32>
    %48 = arith.select %45, %43, %47 : vector<8x128xi1>, vector<8x128xf32>
    %c0_32 = arith.constant 0 : index
    %c0_33 = arith.constant 0 : index
    %49 = vector.load %arg11[%c0_32, %c0_33] : memref<128x128xf32, #tpu.memory_space<vmem>>, vector<128x128xf32>
    %cst_34 = arith.constant dense<0.000000e+00> : vector<8x128xf32>
    %50 = tpu.matmul %48, %49, %cst_34 {dimension_numbers = #tpu.dot_dimension_numbers<[1], [0], [0], [1], [0, 0, 1, 1], [], []>} : vector<8x128xf32>, vector<128x128xf32>, vector<8x128xf32> -> vector<8x128xf32>
    %c0_35 = arith.constant 0 : index
    %c0_36 = arith.constant 0 : index
    %51 = vector.load %arg12[%c0_35, %c0_36] : memref<1x128xf32, #tpu.memory_space<vmem>>, vector<1x128xf32>
    %52 = vector.broadcast %51 : vector<1x128xf32> to vector<8x128xf32>
    %53 = arith.addf %50, %52 : vector<8x128xf32>
    %cst_37 = arith.constant 0.000000e+00 : f32
    %54 = vector.broadcast %cst_37 : f32 to vector<8x128xf32>
    %55 = arith.cmpf oge, %53, %54 : vector<8x128xf32>
    %cst_38 = arith.constant 2.000000e-01 : f32
    %56 = vector.broadcast %cst_38 : f32 to vector<8x128xf32>
    %57 = arith.mulf %56, %53 : vector<8x128xf32>
    %58 = arith.select %55, %53, %57 : vector<8x128xi1>, vector<8x128xf32>
    %c0_39 = arith.constant 0 : index
    %c0_40 = arith.constant 0 : index
    %59 = vector.load %arg13[%c0_39, %c0_40] : memref<128x256xf32, #tpu.memory_space<vmem>>, vector<128x256xf32>
    %cst_41 = arith.constant dense<0.000000e+00> : vector<8x256xf32>
    %60 = tpu.matmul %58, %59, %cst_41 {dimension_numbers = #tpu.dot_dimension_numbers<[1], [0], [0], [1], [0, 0, 1, 1], [], []>} : vector<8x128xf32>, vector<128x256xf32>, vector<8x256xf32> -> vector<8x256xf32>
    %c0_42 = arith.constant 0 : index
    %c0_43 = arith.constant 0 : index
    %61 = vector.load %arg14[%c0_42, %c0_43] : memref<1x256xf32, #tpu.memory_space<vmem>>, vector<1x256xf32>
    %62 = vector.broadcast %61 : vector<1x256xf32> to vector<8x256xf32>
    %63 = arith.addf %60, %62 : vector<8x256xf32>
    %64 = vector.extract_strided_slice %63 {offsets = [0, 0], sizes = [8, 128], strides = [1, 1]} : vector<8x256xf32> to vector<8x128xf32>
    %65 = vector.extract_strided_slice %63 {offsets = [0, 128], sizes = [8, 128], strides = [1, 1]} : vector<8x256xf32> to vector<8x128xf32>
    %66 = math.exp %65 : vector<8x128xf32>
    %cst_44 = arith.constant 9.99999993E-9 : f32
    %67 = vector.broadcast %cst_44 : f32 to vector<8x128xf32>
    %68 = arith.addf %66, %67 : vector<8x128xf32>
    %cst_45 = arith.constant 1.000000e+00 : f32
    %69 = vector.broadcast %cst_45 : f32 to vector<8x128xf32>
    %70 = arith.divf %69, %68 : vector<8x128xf32>
    %71 = arith.addf %35, %70 : vector<8x128xf32>
    %72 = arith.mulf %64, %70 : vector<8x128xf32>
    %73 = arith.addf %37, %72 : vector<8x128xf32>
    %74 = arith.divf %73, %71 : vector<8x128xf32>
    %75 = math.log %71 : vector<8x128xf32>
    %cst_46 = arith.constant 0.000000e+00 : f32
    %76 = vector.broadcast %cst_46 : f32 to vector<8x128xf32>
    %77 = arith.subf %76, %75 : vector<8x128xf32>
    %78 = math.rsqrt %71 : vector<8x128xf32>
    %c0_47 = arith.constant 0 : index
    %c0_48 = arith.constant 0 : index
    %79 = vector.load %arg27[%c0_47, %c0_48] : memref<8x128xf32, #tpu.memory_space<vmem>>, vector<8x128xf32>
    %80 = arith.mulf %79, %78 : vector<8x128xf32>
    %81 = arith.addf %74, %80 : vector<8x128xf32>
    %c0_49 = arith.constant 0 : index
    %c0_50 = arith.constant 0 : index
    %82 = vector.load %arg30[%c0_49, %c0_50] : memref<8x128xf32, #tpu.memory_space<vmem>>, vector<8x128xf32>
    tpu.vector_store %arg30[%c0_49, %c0_50], %74 {strides = array<i32>} : memref<8x128xf32, #tpu.memory_space<vmem>>, vector<8x128xf32>,
    %c0_51 = arith.constant 0 : index
    %c0_52 = arith.constant 0 : index
    %83 = vector.load %arg31[%c0_51, %c0_52] : memref<8x128xf32, #tpu.memory_space<vmem>>, vector<8x128xf32>
    tpu.vector_store %arg31[%c0_51, %c0_52], %77 {strides = array<i32>} : memref<8x128xf32, #tpu.memory_space<vmem>>, vector<8x128xf32>,
    %c0_53 = arith.constant 0 : index
    %c0_54 = arith.constant 0 : index
    %84 = vector.load %arg15[%c0_53, %c0_54] : memref<128x128xf32, #tpu.memory_space<vmem>>, vector<128x128xf32>
    %cst_55 = arith.constant dense<0.000000e+00> : vector<8x128xf32>
    %85 = tpu.matmul %81, %84, %cst_55 {dimension_numbers = #tpu.dot_dimension_numbers<[1], [0], [0], [1], [0, 0, 1, 1], [], []>} : vector<8x128xf32>, vector<128x128xf32>, vector<8x128xf32> -> vector<8x128xf32>
    %c0_56 = arith.constant 0 : index
    %c0_57 = arith.constant 0 : index
    %86 = vector.load %arg16[%c0_56, %c0_57] : memref<1x128xf32, #tpu.memory_space<vmem>>, vector<1x128xf32>
    %87 = vector.broadcast %86 : vector<1x128xf32> to vector<8x128xf32>
    %88 = arith.addf %85, %87 : vector<8x128xf32>
    %cst_58 = arith.constant 0.000000e+00 : f32
    %89 = vector.broadcast %cst_58 : f32 to vector<8x128xf32>
    %90 = arith.cmpf oge, %88, %89 : vector<8x128xf32>
    %cst_59 = arith.constant 2.000000e-01 : f32
    %91 = vector.broadcast %cst_59 : f32 to vector<8x128xf32>
    %92 = arith.mulf %91, %88 : vector<8x128xf32>
    %93 = arith.select %90, %88, %92 : vector<8x128xi1>, vector<8x128xf32>
    %c0_60 = arith.constant 0 : index
    %c0_61 = arith.constant 0 : index
    %94 = vector.load %arg17[%c0_60, %c0_61] : memref<128x128xf32, #tpu.memory_space<vmem>>, vector<128x128xf32>
    %cst_62 = arith.constant dense<0.000000e+00> : vector<8x128xf32>
    %95 = tpu.matmul %93, %94, %cst_62 {dimension_numbers = #tpu.dot_dimension_numbers<[1], [0], [0], [1], [0, 0, 1, 1], [], []>} : vector<8x128xf32>, vector<128x128xf32>, vector<8x128xf32> -> vector<8x128xf32>
    %c0_63 = arith.constant 0 : index
    %c0_64 = arith.constant 0 : index
    %96 = vector.load %arg18[%c0_63, %c0_64] : memref<1x128xf32, #tpu.memory_space<vmem>>, vector<1x128xf32>
    %97 = vector.broadcast %96 : vector<1x128xf32> to vector<8x128xf32>
    %98 = arith.addf %95, %97 : vector<8x128xf32>
    %cst_65 = arith.constant 0.000000e+00 : f32
    %99 = vector.broadcast %cst_65 : f32 to vector<8x128xf32>
    %100 = arith.cmpf oge, %98, %99 : vector<8x128xf32>
    %cst_66 = arith.constant 2.000000e-01 : f32
    %101 = vector.broadcast %cst_66 : f32 to vector<8x128xf32>
    %102 = arith.mulf %101, %98 : vector<8x128xf32>
    %103 = arith.select %100, %98, %102 : vector<8x128xi1>, vector<8x128xf32>
    %c0_67 = arith.constant 0 : index
    %c0_68 = arith.constant 0 : index
    %104 = vector.load %arg19[%c0_67, %c0_68] : memref<128x128xf32, #tpu.memory_space<vmem>>, vector<128x128xf32>
    %cst_69 = arith.constant dense<0.000000e+00> : vector<8x128xf32>
    %105 = tpu.matmul %103, %104, %cst_69 {dimension_numbers = #tpu.dot_dimension_numbers<[1], [0], [0], [1], [0, 0, 1, 1], [], []>} : vector<8x128xf32>, vector<128x128xf32>, vector<8x128xf32> -> vector<8x128xf32>
    %c0_70 = arith.constant 0 : index
    %c0_71 = arith.constant 0 : index
    %106 = vector.load %arg20[%c0_70, %c0_71] : memref<1x128xf32, #tpu.memory_space<vmem>>, vector<1x128xf32>
    %107 = vector.broadcast %106 : vector<1x128xf32> to vector<8x128xf32>
    %108 = arith.addf %105, %107 : vector<8x128xf32>
    %c0_72 = arith.constant 0 : index
    %c0_73 = arith.constant 0 : index
    %109 = vector.load %arg28[%c0_72, %c0_73] : memref<8x128xf32, #tpu.memory_space<vmem>>, vector<8x128xf32>
    tpu.vector_store %arg28[%c0_72, %c0_73], %108 {strides = array<i32>} : memref<8x128xf32, #tpu.memory_space<vmem>>, vector<8x128xf32>,
    %c0_74 = arith.constant 0 : index
    %c0_75 = arith.constant 0 : index
    %110 = vector.load %arg21[%c0_74, %c0_75] : memref<128x128xf32, #tpu.memory_space<vmem>>, vector<128x128xf32>
    %cst_76 = arith.constant dense<0.000000e+00> : vector<8x128xf32>
    %111 = tpu.matmul %81, %110, %cst_76 {dimension_numbers = #tpu.dot_dimension_numbers<[1], [0], [0], [1], [0, 0, 1, 1], [], []>} : vector<8x128xf32>, vector<128x128xf32>, vector<8x128xf32> -> vector<8x128xf32>
    %c0_77 = arith.constant 0 : index
    %c0_78 = arith.constant 0 : index
    %112 = vector.load %arg22[%c0_77, %c0_78] : memref<1x128xf32, #tpu.memory_space<vmem>>, vector<1x128xf32>
    %113 = vector.broadcast %112 : vector<1x128xf32> to vector<8x128xf32>
    %114 = arith.addf %111, %113 : vector<8x128xf32>
    %cst_79 = arith.constant 0.000000e+00 : f32
    %115 = vector.broadcast %cst_79 : f32 to vector<8x128xf32>
    %116 = arith.cmpf oge, %114, %115 : vector<8x128xf32>
    %cst_80 = arith.constant 2.000000e-01 : f32
    %117 = vector.broadcast %cst_80 : f32 to vector<8x128xf32>
    %118 = arith.mulf %117, %114 : vector<8x128xf32>
    %119 = arith.select %116, %114, %118 : vector<8x128xi1>, vector<8x128xf32>
    %c0_81 = arith.constant 0 : index
    %c0_82 = arith.constant 0 : index
    %120 = vector.load %arg23[%c0_81, %c0_82] : memref<128x128xf32, #tpu.memory_space<vmem>>, vector<128x128xf32>
    %cst_83 = arith.constant dense<0.000000e+00> : vector<8x128xf32>
    %121 = tpu.matmul %119, %120, %cst_83 {dimension_numbers = #tpu.dot_dimension_numbers<[1], [0], [0], [1], [0, 0, 1, 1], [], []>} : vector<8x128xf32>, vector<128x128xf32>, vector<8x128xf32> -> vector<8x128xf32>
    %c0_84 = arith.constant 0 : index
    %c0_85 = arith.constant 0 : index
    %122 = vector.load %arg24[%c0_84, %c0_85] : memref<1x128xf32, #tpu.memory_space<vmem>>, vector<1x128xf32>
    %123 = vector.broadcast %122 : vector<1x128xf32> to vector<8x128xf32>
    %124 = arith.addf %121, %123 : vector<8x128xf32>
    %cst_86 = arith.constant 0.000000e+00 : f32
    %125 = vector.broadcast %cst_86 : f32 to vector<8x128xf32>
    %126 = arith.cmpf oge, %124, %125 : vector<8x128xf32>
    %cst_87 = arith.constant 2.000000e-01 : f32
    %127 = vector.broadcast %cst_87 : f32 to vector<8x128xf32>
    %128 = arith.mulf %127, %124 : vector<8x128xf32>
    %129 = arith.select %126, %124, %128 : vector<8x128xi1>, vector<8x128xf32>
    %c0_88 = arith.constant 0 : index
    %c0_89 = arith.constant 0 : index
    %130 = vector.load %arg25[%c0_88, %c0_89] : memref<128x128xf32, #tpu.memory_space<vmem>>, vector<128x128xf32>
    %cst_90 = arith.constant dense<0.000000e+00> : vector<8x128xf32>
    %131 = tpu.matmul %129, %130, %cst_90 {dimension_numbers = #tpu.dot_dimension_numbers<[1], [0], [0], [1], [0, 0, 1, 1], [], []>} : vector<8x128xf32>, vector<128x128xf32>, vector<8x128xf32> -> vector<8x128xf32>
    %c0_91 = arith.constant 0 : index
    %c0_92 = arith.constant 0 : index
    %132 = vector.load %arg26[%c0_91, %c0_92] : memref<1x128xf32, #tpu.memory_space<vmem>>, vector<1x128xf32>
    %133 = vector.broadcast %132 : vector<1x128xf32> to vector<8x128xf32>
    %134 = arith.addf %131, %133 : vector<8x128xf32>
    %c0_93 = arith.constant 0 : index
    %c0_94 = arith.constant 0 : index
    %135 = vector.load %arg29[%c0_93, %c0_94] : memref<8x128xf32, #tpu.memory_space<vmem>>, vector<8x128xf32>
    tpu.vector_store %arg29[%c0_93, %c0_94], %134 {strides = array<i32>} : memref<8x128xf32, #tpu.memory_space<vmem>>, vector<8x128xf32>,
    return
  }
  func.func @transform_0(%arg0: i32) -> (i32, i32) {
    %c0_i32 = arith.constant 0 : i32
    %c0_i32_0 = arith.constant 0 : i32
    %c0_i32_1 = arith.constant 0 : i32
    return %c0_i32, %c0_i32_0 : i32, i32
  }
  func.func @transform_1(%arg0: i32) -> (i32, i32) {
    %c0_i32 = arith.constant 0 : i32
    %c0_i32_0 = arith.constant 0 : i32
    %c0_i32_1 = arith.constant 0 : i32
    return %c0_i32, %c0_i32_0 : i32, i32
  }
  func.func @transform_2(%arg0: i32) -> (i32, i32) {
    %c0_i32 = arith.constant 0 : i32
    %c0_i32_0 = arith.constant 0 : i32
    %c0_i32_1 = arith.constant 0 : i32
    return %c0_i32, %c0_i32_0 : i32, i32
  }
  func.func @transform_3(%arg0: i32) -> (i32, i32) {
    %c0_i32 = arith.constant 0 : i32
    %c0_i32_0 = arith.constant 0 : i32
    %c0_i32_1 = arith.constant 0 : i32
    return %c0_i32, %c0_i32_0 : i32, i32
  }
  func.func @transform_4(%arg0: i32) -> (i32, i32) {
    %c0_i32 = arith.constant 0 : i32
    %c0_i32_0 = arith.constant 0 : i32
    %c0_i32_1 = arith.constant 0 : i32
    return %c0_i32, %c0_i32_0 : i32, i32
  }
  func.func @transform_5(%arg0: i32) -> (i32, i32) {
    %c0_i32 = arith.constant 0 : i32
    %c0_i32_0 = arith.constant 0 : i32
    %c0_i32_1 = arith.constant 0 : i32
    return %c0_i32, %c0_i32_0 : i32, i32
  }
  func.func @transform_6(%arg0: i32) -> (i32, i32) {
    %c0_i32 = arith.constant 0 : i32
    %c0_i32_0 = arith.constant 0 : i32
    %c0_i32_1 = arith.constant 0 : i32
    return %c0_i32, %c0_i32_0 : i32, i32
  }
  func.func @transform_7(%arg0: i32) -> (i32, i32) {
    %c0_i32 = arith.constant 0 : i32
    %c0_i32_0 = arith.constant 0 : i32
    %c0_i32_1 = arith.constant 0 : i32
    return %c0_i32, %c0_i32_0 : i32, i32
  }
  func.func @transform_8(%arg0: i32) -> (i32, i32) {
    %c0_i32 = arith.constant 0 : i32
    %c0_i32_0 = arith.constant 0 : i32
    %c0_i32_1 = arith.constant 0 : i32
    return %c0_i32, %c0_i32_0 : i32, i32
  }
  func.func @transform_9(%arg0: i32) -> (i32, i32) {
    %c0_i32 = arith.constant 0 : i32
    %c0_i32_0 = arith.constant 0 : i32
    %c0_i32_1 = arith.constant 0 : i32
    return %c0_i32, %c0_i32_0 : i32, i32
  }
  func.func @transform_10(%arg0: i32) -> (i32, i32) {
    %c0_i32 = arith.constant 0 : i32
    %c0_i32_0 = arith.constant 0 : i32
    %c0_i32_1 = arith.constant 0 : i32
    return %c0_i32, %c0_i32_0 : i32, i32
  }
  func.func @transform_11(%arg0: i32) -> (i32, i32) {
    %c0_i32 = arith.constant 0 : i32
    %c0_i32_0 = arith.constant 0 : i32
    %c0_i32_1 = arith.constant 0 : i32
    return %c0_i32, %c0_i32_0 : i32, i32
  }
  func.func @transform_12(%arg0: i32) -> (i32, i32) {
    %c0_i32 = arith.constant 0 : i32
    %c0_i32_0 = arith.constant 0 : i32
    %c0_i32_1 = arith.constant 0 : i32
    return %c0_i32, %c0_i32_0 : i32, i32
  }
  func.func @transform_13(%arg0: i32) -> (i32, i32) {
    %c0_i32 = arith.constant 0 : i32
    %c0_i32_0 = arith.constant 0 : i32
    %c0_i32_1 = arith.constant 0 : i32
    return %c0_i32, %c0_i32_0 : i32, i32
  }
  func.func @transform_14(%arg0: i32) -> (i32, i32) {
    %c0_i32 = arith.constant 0 : i32
    %c0_i32_0 = arith.constant 0 : i32
    %c0_i32_1 = arith.constant 0 : i32
    return %c0_i32, %c0_i32_0 : i32, i32
  }
  func.func @transform_15(%arg0: i32) -> (i32, i32) {
    %c0_i32 = arith.constant 0 : i32
    %c0_i32_0 = arith.constant 0 : i32
    %c0_i32_1 = arith.constant 0 : i32
    return %c0_i32, %c0_i32_0 : i32, i32
  }
  func.func @transform_16(%arg0: i32) -> (i32, i32) {
    %c0_i32 = arith.constant 0 : i32
    %c0_i32_0 = arith.constant 0 : i32
    %c0_i32_1 = arith.constant 0 : i32
    return %c0_i32, %c0_i32_0 : i32, i32
  }
  func.func @transform_17(%arg0: i32) -> (i32, i32) {
    %c0_i32 = arith.constant 0 : i32
    %c0_i32_0 = arith.constant 0 : i32
    %c0_i32_1 = arith.constant 0 : i32
    return %c0_i32, %c0_i32_0 : i32, i32
  }
  func.func @transform_18(%arg0: i32) -> (i32, i32) {
    %c0_i32 = arith.constant 0 : i32
    %c0_i32_0 = arith.constant 0 : i32
    %c0_i32_1 = arith.constant 0 : i32
    return %c0_i32, %c0_i32_0 : i32, i32
  }
  func.func @transform_19(%arg0: i32) -> (i32, i32) {
    %c0_i32 = arith.constant 0 : i32
    %c0_i32_0 = arith.constant 0 : i32
    %c0_i32_1 = arith.constant 0 : i32
    return %c0_i32, %c0_i32_0 : i32, i32
  }
  func.func @transform_20(%arg0: i32) -> (i32, i32) {
    %c0_i32 = arith.constant 0 : i32
    %c0_i32_0 = arith.constant 0 : i32
    %c0_i32_1 = arith.constant 0 : i32
    return %c0_i32, %c0_i32_0 : i32, i32
  }
  func.func @transform_21(%arg0: i32) -> (i32, i32) {
    %c0_i32 = arith.constant 0 : i32
    %c0_i32_0 = arith.constant 0 : i32
    %c0_i32_1 = arith.constant 0 : i32
    return %c0_i32, %c0_i32_0 : i32, i32
  }
  func.func @transform_22(%arg0: i32) -> (i32, i32) {
    %c0_i32 = arith.constant 0 : i32
    %c0_i32_0 = arith.constant 0 : i32
    %c0_i32_1 = arith.constant 0 : i32
    return %c0_i32, %c0_i32_0 : i32, i32
  }
  func.func @transform_23(%arg0: i32) -> (i32, i32) {
    %c0_i32 = arith.constant 0 : i32
    %c0_i32_0 = arith.constant 0 : i32
    %c0_i32_1 = arith.constant 0 : i32
    return %c0_i32, %c0_i32_0 : i32, i32
  }
  func.func @transform_24(%arg0: i32) -> (i32, i32) {
    %c0_i32 = arith.constant 0 : i32
    %c0_i32_0 = arith.constant 0 : i32
    %c0_i32_1 = arith.constant 0 : i32
    return %c0_i32, %c0_i32_0 : i32, i32
  }
  func.func @transform_25(%arg0: i32) -> (i32, i32) {
    %c0_i32 = arith.constant 0 : i32
    %c0_i32_0 = arith.constant 0 : i32
    %c0_i32_1 = arith.constant 0 : i32
    return %c0_i32, %c0_i32_0 : i32, i32
  }
  func.func @transform_26(%arg0: i32) -> (i32, i32) {
    %c0_i32 = arith.constant 0 : i32
    %c0_i32_0 = arith.constant 0 : i32
    %c0_i32_1 = arith.constant 0 : i32
    return %c0_i32, %c0_i32_0 : i32, i32
  }
  func.func @transform_27(%arg0: i32) -> (i32, i32) {
    %c0_i32 = arith.constant 0 : i32
    %c0_i32_0 = arith.constant 0 : i32
    %c0_i32_1 = arith.constant 0 : i32
    return %c0_i32, %c0_i32_0 : i32, i32
  }
  func.func @transform_28(%arg0: i32) -> (i32, i32) {
    %c0_i32 = arith.constant 0 : i32
    %c0_i32_0 = arith.constant 0 : i32
    %c0_i32_1 = arith.constant 0 : i32
    return %c0_i32, %c0_i32_0 : i32, i32
  }
  func.func @transform_29(%arg0: i32) -> (i32, i32) {
    %c0_i32 = arith.constant 0 : i32
    %c0_i32_0 = arith.constant 0 : i32
    %c0_i32_1 = arith.constant 0 : i32
    return %c0_i32, %c0_i32_0 : i32, i32
  }
  func.func @transform_30(%arg0: i32) -> (i32, i32) {
    %c0_i32 = arith.constant 0 : i32
    %c0_i32_0 = arith.constant 0 : i32
    %c0_i32_1 = arith.constant 0 : i32
    return %c0_i32, %c0_i32_0 : i32, i32
  }
}

</mosaic_0001>

<bundles_post_ra>
// kernel: tpu_custom_call.1
= control target key start
LH: loop header
LB: loop body
LE: loop exit
PB: predicated region body
PF: predicated region fallthrough
CT: control target
= control target key end

     0   :  { %s1708_s6 = smov 1   ;;  %s1709_s10 = smov 2   ;;  %s2132_s0 = inlined_call_operand.smem [shape: u32[31], index: -1, kind: input, shape index: {}] }
   0x1   :  { %s1770_s5 = sld [smem:[%s2132_s0]]   ;;  %s1710_s14 = smov 3  }
   0x2   :  { %s1775_s9 = sld [smem:[%s2132_s0 + %s1708_s6]]   ;;  %s1711_s18 = smov 4  }
   0x3   :  { %s1780_s13 = sld [smem:[%s2132_s0 + %s1709_s10]]   ;;  %s1712_s22 = smov 5  }
   0x4   :  { %s1785_s17 = sld [smem:[%s2132_s0 + %s1710_s14]]   ;;  %s1713_s26 = smov 6  }
   0x5   :  { %s1790_s21 = sld [smem:[%s2132_s0 + %s1711_s18]]   ;;  %s1714_s30 = smov 7  }
   0x6   :  { %s1795_s25 = sld [smem:[%s2132_s0 + %s1712_s22]]   ;;  %s1715_s4 = smov 8  }
   0x7   :  { %s1800_s29 = sld [smem:[%s2132_s0 + %s1713_s26]]   ;;  %s1716_s10 = smov 9  }
   0x8   :  { %s1805_s3 = sld [smem:[%s2132_s0 + %s1714_s30]]   ;;  %s1717_s15 = smov 10  }
   0x9   :  { %s1810_s8 = sld [smem:[%s2132_s0 + %s1715_s4]]   ;;  %s1718_s20 = smov 11  }
   0xa   :  { %s1815_s14 = sld [smem:[%s2132_s0 + %s1716_s10]]   ;;  %s1719_s26 = smov 12  }
   0xb   :  { %s1820_s19 = sld [smem:[%s2132_s0 + %s1717_s15]]   ;;  %s1720_s1 = smov 13  }
   0xc   :  { %s1825_s24 = sld [smem:[%s2132_s0 + %s1718_s20]]   ;;  %s1721_s7 = smov 14  }
   0xd   :  { %s1830_s30 = sld [smem:[%s2132_s0 + %s1719_s26]]   ;;  %s1722_s15 = smov 15  }
   0xe   :  { %2135 = sst [smem:[#allocation46_spill]] %s1805_s3  ;;  %s1723_s22 = smov 16  }
   0xf   :  { %s1835_s6 = sld [smem:[%s2132_s0 + %s1720_s1]]   ;;  %s1724_s28 = smov 17  }
  0x10   :  { %2136 = sst [smem:[#allocation47_spill]] %s1815_s14 }
  0x11   :  { %s1840_s12 = sld [smem:[%s2132_s0 + %s1721_s7]]   ;;  %s1725_s7 = smov 18  }
  0x12   :  { %2137 = sst [smem:[#allocation48_spill]] %s1825_s24 }
  0x13   :  { %s1845_s20 = sld [smem:[%s2132_s0 + %s1722_s15]]   ;;  %s1726_s15 = smov 19  }
  0x14   :  { %s1850_s27 = sld [smem:[%s2132_s0 + %s1723_s22]]   ;;  %s1727_s22 = smov 20  }
  0x15   :  { %2138 = sst [smem:[#allocation49_spill]] %s1835_s6 }
  0x16   :  { %s1855_s4 = sld [smem:[%s2132_s0 + %s1724_s28]]   ;;  %s1728_s28 = smov 21  }
  0x17   :  { %s1860_s6 = sld [smem:[%s2132_s0 + %s1725_s7]]   ;;  %s1729_s7 = smov 22  }
  0x18   :  { %s1870_s3 = sld [smem:[%s2132_s0 + %s1727_s22]]   ;;  %s1731_s22 = smov 24  }
  0x19   :  { %2139 = sst [smem:[#allocation50_spill]] %s1845_s20 }
  0x1a   :  { %s1865_s20 = sld [smem:[%s2132_s0 + %s1726_s15]]   ;;  %s1730_s15 = smov 23  }
  0x1b   :  { %s1880_s24 = sld [smem:[%s2132_s0 + %s1729_s7]]   ;;  %s1733_s7 = smov 26  }
  0x1c   :  { %2140 = sst [smem:[#allocation51_spill]] %s1855_s4 }
  0x1d   :  { %s1875_s4 = sld [smem:[%s2132_s0 + %s1728_s28]]   ;;  %s1732_s28 = smov 25  }
  0x1e   :  { %s1890_s14 = sld [smem:[%s2132_s0 + %s1731_s22]]   ;;  %s1735_s22 = smov 28  }
  0x20   :  { %2141 = sst [smem:[#allocation52_spill]] %s1865_s20 }
  0x21   :  { %2143 = sst [smem:[#allocation54_spill]] %s1880_s24 }
  0x22   :  { %s1885_s20 = sld [smem:[%s2132_s0 + %s1730_s15]]   ;;  %s1734_s15 = smov 27  }
  0x23   :  { %2142 = sst [smem:[#allocation53_spill]] %s1875_s4 }
  0x24   :  { %2145 = sst [smem:[#allocation56_spill]] %s1890_s14 }
  0x25   :  { %s1895_s4 = sld [smem:[%s2132_s0 + %s1732_s28]]   ;;  %s1736_s28 = smov 29  }
  0x26   :  { %s1900_s24 = sld [smem:[%s2132_s0 + %s1733_s7]]   ;;  %s1737_s7 = smov 30  }
  0x27   :  { %s1910_s14 = sld [smem:[%s2132_s0 + %s1735_s22]]  }
  0x28   :  { %2144 = sst [smem:[#allocation55_spill]] %s1885_s20 }
  0x29   :  { %s1905_s20 = sld [smem:[%s2132_s0 + %s1734_s15]]  }
  0x2b   :  { %2146 = sst [smem:[#allocation57_spill]] %s1895_s4 }
  0x2c   :  { %2147 = sst [smem:[#allocation58_spill]] %s1900_s24 }
  0x2d   :  { %s1915_s4 = sld [smem:[%s2132_s0 + %s1736_s28]]  }
  0x2e   :  { %s1920_s24 = sld [smem:[%s2132_s0 + %s1737_s7]]  }
  0x2f   :  { %67 = vsyncpa [#allocation3], 0 }
  0x30   :  { %68 = vsyncpa [#allocation6], 0 }
  0x31   :  { %69 = vsyncpa [#allocation9], 0 }
  0x32   :  { %70 = vsyncpa [#allocation12], 0 }
  0x33   :  { %71 = vsyncpa [#allocation15], 0 }
  0x34   :  { %72 = vsyncpa [#allocation18], 0 }
  0x35   :  { %73 = vsyncpa [#allocation21], 0 }
  0x36   :  { %74 = vsyncpa [#allocation24], 0 }
  0x37   :  { %75 = vsyncpa [#allocation27], 0 }
  0x38   :  { %76 = vsyncpa [#allocation4], 0 }
  0x39   :  { %77 = vsyncpa [#allocation30], 0  ;;  %s95_s15 = sshll.u32 %s1775_s9, 4  ;;  %s96_s15 = int_to_ptr.hbm [resolvable:$true] %s95_s15 }
  0x3a   :  { %78 = vsyncpa [#allocation33], 0  ;;  %s1738_s0 = smov [#allocation5]   ;;  %s119_s18 = sshll.u32 %s1785_s17, 4  ;;  %s120_s18 = int_to_ptr.hbm [resolvable:$true] %s119_s18 }
  0x3b   :  { %s97_s16 = sshll.u32 %s1738_s0, 4  ;;  %s1204_s22 = sshra.s32 %s96_s15, 4  ;;  %s98_s16 = int_to_ptr.vmem [resolvable:$true] %s97_s16  ;;  %s1205_s22 = int_to_ptr.hbm [resolvable:$true] %s1204_s22 }
  0x3c   :  { %s1206_s23 = scalar_lea.hbm %s1205_s22, 8  ;;  %s1208_s26 = scalar_lea.hbm %s1775_s9, 8 }
  0x3d   :  { %p1207_p0 = scmp.ne.s32.totalorder %s1205_s22, %s1206_s23  ;;  %p1209_p1 = scmp.lt.s32.totalorder %s1205_s22, %s1775_s9 }
  0x3e   :  { %p1210_p2 = scmp.lt.s32.totalorder %s1208_s26, %s1206_s23 }
  0x40   :  { %p1211_p3 = por %p1210_p2, %p1209_p1 }
  0x42   :  { %p1212_p4 = pnand %p1211_p3, %p1207_p0 }
  0x44   :  { %1215 = shalt.err (!%p1212_p4)
}
  0x45   :  { %100 = dma.hbm_to_vmem [thread:$0]  %s96_s15, 128, %s98_s16, [#allocation6]  }
  0x46   :  { %s1739_s28 = smov [#allocation8]   ;;  %s143_s2 = sshll.u32 %s1795_s25, 4  ;;  %s144_s2 = int_to_ptr.hbm [resolvable:$true] %s143_s2 }
  0x47   :  { %s121_s1 = sshll.u32 %s1739_s28, 4  ;;  %s1228_s7 = sshra.s32 %s120_s18, 4  ;;  %s122_s1 = int_to_ptr.vmem [resolvable:$true] %s121_s1  ;;  %s1229_s7 = int_to_ptr.hbm [resolvable:$true] %s1228_s7 }
  0x48   :  { %s1230_s10 = scalar_lea.hbm %s1229_s7, 1  ;;  %s1232_s11 = scalar_lea.hbm %s1785_s17, 1 }
  0x49   :  { %p1231_p5 = scmp.ne.s32.totalorder %s1229_s7, %s1230_s10  ;;  %p1233_p6 = scmp.lt.s32.totalorder %s1229_s7, %s1785_s17 }
  0x4a   :  { %p1234_p7 = scmp.lt.s32.totalorder %s1232_s11, %s1230_s10 }
  0x4c   :  { %p1235_p8 = por %p1234_p7, %p1233_p6 }
  0x4e   :  { %p1236_p9 = pnand %p1235_p8, %p1231_p5 }
  0x50   :  { %1239 = shalt.err (!%p1236_p9)
}
  0x51   :  { %124 = dma.hbm_to_vmem [thread:$0]  %s120_s18, 16, %s122_s1, [#allocation9]  }
  0x52   :  { %s1740_s9 = smov [#allocation11]   ;;  %s168_s0 = sshll.u32 %s1810_s8, 4  ;;  %s169_s0 = int_to_ptr.hbm [resolvable:$true] %s168_s0 }
  0x53   :  { %s145_s15 = sshll.u32 %s1740_s9, 4  ;;  %s1252_s16 = sshra.s32 %s144_s2, 4  ;;  %s146_s15 = int_to_ptr.vmem [resolvable:$true] %s145_s15  ;;  %s1253_s16 = int_to_ptr.hbm [resolvable:$true] %s1252_s16 }
  0x54   :  { %s1254_s22 = scalar_lea.hbm %s1253_s16, 1  ;;  %s1256_s23 = scalar_lea.hbm %s1795_s25, 1 }
  0x55   :  { %p1255_p10 = scmp.ne.s32.totalorder %s1253_s16, %s1254_s22  ;;  %p1257_p11 = scmp.lt.s32.totalorder %s1253_s16, %s1795_s25 }
  0x56   :  { %p1258_p12 = scmp.lt.s32.totalorder %s1256_s23, %s1254_s22 }
  0x58   :  { %p1259_p13 = por %p1258_p12, %p1257_p11 }
  0x5a   :  { %p1260_p0 = pnand %p1259_p13, %p1255_p10 }
  0x5c   :  { %1263 = shalt.err (!%p1260_p0)
}
  0x5d   :  { %148 = dma.hbm_to_vmem [thread:$0]  %s144_s2, 16, %s146_s15, [#allocation12]  }
  0x5e   :  { %s1741_s17 = smov [#allocation14]   ;;  %s1276_s26 = sshra.s32 %s169_s0, 4  ;;  %s1277_s26 = int_to_ptr.hbm [resolvable:$true] %s1276_s26 }
  0x5f   :  { %s170_s18 = sshll.u32 %s1741_s17, 4  ;;  %s1278_s28 = scalar_lea.hbm %s1277_s26, 128  ;;  %s171_s18 = int_to_ptr.vmem [resolvable:$true] %s170_s18 }
  0x60   :  { %p1279_p1 = scmp.ne.s32.totalorder %s1277_s26, %s1278_s28  ;;  %s1280_s1 = scalar_lea.hbm %s1810_s8, 128 }
  0x61   :  { %p1281_p2 = scmp.lt.s32.totalorder %s1277_s26, %s1810_s8  ;;  %p1282_p3 = scmp.lt.s32.totalorder %s1280_s1, %s1278_s28 }
  0x63   :  { %p1283_p4 = por %p1282_p3, %p1281_p2 }
  0x65   :  { %p1284_p5 = pnand %p1283_p4, %p1279_p1 }
  0x67   :  { %1287 = shalt.err (!%p1284_p5)
}
  0x68   :  { %s1742_s25 = smov 128   ;;  %s1743_s2 = smov 8  }
  0x69   :  { %176 = dma.hbm_to_vmem [thread:$0]  %s169_s0, 2048, %s171_s18, [#allocation15], %s1742_s25, %s1742_s25, %s1743_s2  }
  0x6a   :  { %s198_s7 = sshll.u32 %s1830_s30, 4  ;;  %s1744_s10 = smov [#allocation17]   ;;  %s199_s7 = int_to_ptr.hbm [resolvable:$true] %s198_s7 }
  0x6b   :  { %s200_s11 = sshll.u32 %s1744_s10, 4  ;;  %s228_s8 = sshll.u32 %s1850_s27, 4  ;;  %s201_s11 = int_to_ptr.vmem [resolvable:$true] %s200_s11  ;;  %s229_s8 = int_to_ptr.hbm [resolvable:$true] %s228_s8 }
  0x6c   :  { %s1300_s9 = sshra.s32 %s199_s7, 4  ;;  %s1304_s16 = scalar_lea.hbm %s1830_s30, 256  ;;  %s1301_s9 = int_to_ptr.hbm [resolvable:$true] %s1300_s9 }
  0x6d   :  { %s1302_s15 = scalar_lea.hbm %s1301_s9, 256  ;;  %p1305_p7 = scmp.lt.s32.totalorder %s1301_s9, %s1830_s30 }
  0x6e   :  { %p1303_p6 = scmp.ne.s32.totalorder %s1301_s9, %s1302_s15  ;;  %p1306_p8 = scmp.lt.s32.totalorder %s1304_s16, %s1302_s15 }
  0x70   :  { %p1307_p9 = por %p1306_p8, %p1305_p7 }
  0x72   :  { %p1308_p10 = pnand %p1307_p9, %p1303_p6 }
  0x74   :  { %1311 = shalt.err (!%p1308_p10)
}
  0x75   :  { %s1745_s22 = smov 256   ;;  %s1746_s0 = smov 16  }
  0x76   :  { %206 = dma.hbm_to_vmem [thread:$0]  %s199_s7, 4096, %s201_s11, [#allocation18], %s1745_s22, %s1745_s22, %s1746_s0  }
  0x77   :  { %s1747_s23 = smov [#allocation20]   ;;  %s258_s18 = sshll.u32 %s1870_s3, 4  ;;  %s1945_s18 = int_to_ptr.hbm [resolvable:$true] %s258_s18 }
  0x78   :  { %s230_s17 = sshll.u32 %s1747_s23, 4  ;;  %s1324_s30 = sshra.s32 %s229_s8, 4  ;;  %s231_s17 = int_to_ptr.vmem [resolvable:$true] %s230_s17  ;;  %s1325_s30 = int_to_ptr.hbm [resolvable:$true] %s1324_s30 }
  0x79   :  { %s1326_s26 = scalar_lea.hbm %s1325_s30, 128  ;;  %s1328_s28 = scalar_lea.hbm %s1850_s27, 128 }
  0x7a   :  { %p1327_p11 = scmp.ne.s32.totalorder %s1325_s30, %s1326_s26  ;;  %p1329_p12 = scmp.lt.s32.totalorder %s1325_s30, %s1850_s27 }
  0x7b   :  { %p1330_p13 = scmp.lt.s32.totalorder %s1328_s28, %s1326_s26 }
  0x7d   :  { %p1331_p0 = por %p1330_p13, %p1329_p12 }
  0x7f   :  { %p1332_p1 = pnand %p1331_p0, %p1327_p11 }
  0x81   :  { %1335 = shalt.err (!%p1332_p1)
}
  0x82   :  { %236 = dma.hbm_to_vmem [thread:$0]  %s229_s8, 2048, %s231_s17, [#allocation21], %s1742_s25, %s1742_s25, %s1743_s2  }
  0x83   :  { %s84_s1 = sshll.u32 %s1770_s5, 4  ;;  %s1748_s7 = smov [#allocation23]   ;;  %s85_s1 = int_to_ptr.hbm [resolvable:$true] %s84_s1 }
  0x84   :  { %s260_s10 = sshll.u32 %s1748_s7, 4  ;;  %s1348_s11 = sshra.s32 %s1945_s18, 4  ;;  %s261_s10 = int_to_ptr.vmem [resolvable:$true] %s260_s10  ;;  %s1349_s11 = int_to_ptr.hbm [resolvable:$true] %s1348_s11 }
  0x85   :  { %s1350_s27 = scalar_lea.hbm %s1349_s11, 128  ;;  %s1352_s9 = scalar_lea.hbm %s1870_s3, 128 }
  0x86   :  { %p1351_p2 = scmp.ne.s32.totalorder %s1349_s11, %s1350_s27  ;;  %p1353_p3 = scmp.lt.s32.totalorder %s1349_s11, %s1870_s3 }
  0x87   :  { %p1354_p4 = scmp.lt.s32.totalorder %s1352_s9, %s1350_s27 }
  0x89   :  { %p1355_p5 = por %p1354_p4, %p1353_p3 }
  0x8b   :  { %p1356_p6 = pnand %p1355_p5, %p1351_p2 }
  0x8d   :  { %1359 = shalt.err (!%p1356_p6)
}
  0x8e   :  { %266 = dma.hbm_to_vmem [thread:$0]  %s1945_s18, 2048, %s261_s10, [#allocation24], %s1742_s25, %s1742_s25, %s1743_s2  }
  0x8f   :  { %s1749_s8 = smov [#allocation2]   ;;  %s105_s16 = sshll.u32 %s1780_s13, 4  ;;  %s1961_s16 = int_to_ptr.hbm [resolvable:$true] %s105_s16 }
  0x90   :  { %s86_s15 = sshll.u32 %s1749_s8, 4  ;;  %s1372_s23 = sshra.s32 %s85_s1, 4  ;;  %s87_s15 = int_to_ptr.vmem [resolvable:$true] %s86_s15  ;;  %s1373_s23 = int_to_ptr.hbm [resolvable:$true] %s1372_s23 }
  0x91   :  { %s1374_s3 = scalar_lea.hbm %s1373_s23, 8  ;;  %s1376_s17 = scalar_lea.hbm %s1770_s5, 8 }
  0x92   :  { %p1375_p7 = scmp.ne.s32.totalorder %s1373_s23, %s1374_s3  ;;  %p1377_p8 = scmp.lt.s32.totalorder %s1373_s23, %s1770_s5 }
  0x93   :  { %p1378_p9 = scmp.lt.s32.totalorder %s1376_s17, %s1374_s3 }
  0x95   :  { %p1379_p10 = por %p1378_p9, %p1377_p8 }
  0x97   :  { %p1380_p11 = pnand %p1379_p10, %p1375_p7 }
  0x99   :  { %1383 = shalt.err (!%p1380_p11)
}
  0x9a   :  { %89 = dma.hbm_to_vmem [thread:$0]  %s85_s1, 128, %s87_s15, [#allocation3]  }
  0x9b   :  { %s129_s18 = sshll.u32 %s1790_s21, 4  ;;  %s1750_s30 = smov [#allocation7]   ;;  %s1966_s18 = int_to_ptr.hbm [resolvable:$true] %s129_s18 }
  0x9c   :  { %s107_s26 = sshll.u32 %s1750_s30, 4  ;;  %s1396_s28 = sshra.s32 %s1961_s16, 4  ;;  %s108_s26 = int_to_ptr.vmem [resolvable:$true] %s107_s26  ;;  %s1397_s28 = int_to_ptr.hbm [resolvable:$true] %s1396_s28 }
  0x9d   :  { %s1398_s7 = scalar_lea.hbm %s1397_s28, 128  ;;  %s1400_s5 = scalar_lea.hbm %s1780_s13, 128 }
  0x9e   :  { %p1399_p12 = scmp.ne.s32.totalorder %s1397_s28, %s1398_s7  ;;  %p1401_p13 = scmp.lt.s32.totalorder %s1397_s28, %s1780_s13 }
  0x9f   :  { %p1402_p0 = scmp.lt.s32.totalorder %s1400_s5, %s1398_s7 }
  0xa1   :  { %p1403_p1 = por %p1402_p0, %p1401_p13 }
  0xa3   :  { %p1404_p2 = pnand %p1403_p1, %p1399_p12 }
  0xa5   :  { %1407 = shalt.err (!%p1404_p2)
}
  0xa6   :  { %113 = dma.hbm_to_vmem [thread:$0]  %s1961_s16, 2048, %s108_s26, [#allocation6], %s1742_s25, %s1742_s25, %s1743_s2  }
  0xa7   :  { %s1751_s1 = smov [#allocation10]   ;;  %s153_s11 = sshll.u32 %s1800_s29, 4  ;;  %s1976_s11 = int_to_ptr.hbm [resolvable:$true] %s153_s11 }
  0xa8   :  { %s131_s10 = sshll.u32 %s1751_s1, 4  ;;  %s1420_s13 = sshra.s32 %s1966_s18, 4  ;;  %s132_s10 = int_to_ptr.vmem [resolvable:$true] %s131_s10  ;;  %s1421_s13 = int_to_ptr.hbm [resolvable:$true] %s1420_s13 }
  0xa9   :  { %s1422_s27 = scalar_lea.hbm %s1421_s13, 128  ;;  %s1424_s9 = scalar_lea.hbm %s1790_s21, 128 }
  0xaa   :  { %p1423_p3 = scmp.ne.s32.totalorder %s1421_s13, %s1422_s27  ;;  %p1425_p4 = scmp.lt.s32.totalorder %s1421_s13, %s1790_s21 }
  0xab   :  { %p1426_p5 = scmp.lt.s32.totalorder %s1424_s9, %s1422_s27 }
  0xad   :  { %p1427_p6 = por %p1426_p5, %p1425_p4 }
  0xaf   :  { %p1428_p7 = pnand %p1427_p6, %p1423_p3 }
  0xb1   :  { %1431 = shalt.err (!%p1428_p7)
}
  0xb2   :  { %137 = dma.hbm_to_vmem [thread:$0]  %s1966_s18, 2048, %s132_s10, [#allocation9], %s1742_s25, %s1742_s25, %s1743_s2  }
  0xb3   :  { %s183_s8 = sshll.u32 %s1820_s19, 4  ;;  %s1752_s15 = smov [#allocation13]   ;;  %s1986_s8 = int_to_ptr.hbm [resolvable:$true] %s183_s8 }
  0xb4   :  { %s155_s16 = sshll.u32 %s1752_s15, 4  ;;  %s1444_s21 = sshra.s32 %s1976_s11, 4  ;;  %s156_s16 = int_to_ptr.vmem [resolvable:$true] %s155_s16  ;;  %s1445_s21 = int_to_ptr.hbm [resolvable:$true] %s1444_s21 }
  0xb5   :  { %s1446_s23 = scalar_lea.hbm %s1445_s21, 256  ;;  %s1448_s3 = scalar_lea.hbm %s1800_s29, 256 }
  0xb6   :  { %p1447_p8 = scmp.ne.s32.totalorder %s1445_s21, %s1446_s23  ;;  %p1449_p9 = scmp.lt.s32.totalorder %s1445_s21, %s1800_s29 }
  0xb7   :  { %p1450_p10 = scmp.lt.s32.totalorder %s1448_s3, %s1446_s23 }
  0xb9   :  { %p1451_p11 = por %p1450_p10, %p1449_p9 }
  0xbb   :  { %p1452_p12 = pnand %p1451_p11, %p1447_p8 }
  0xbd   :  { %1455 = shalt.err (!%p1452_p12)
}
  0xbe   :  { %161 = dma.hbm_to_vmem [thread:$0]  %s1976_s11, 4096, %s156_s16, [#allocation12], %s1745_s22, %s1745_s22, %s1746_s0  }
  0xbf   :  { %s1753_s17 = smov [#allocation16]   ;;  %s213_s30 = sshll.u32 %s1840_s12, 4  ;;  %s1996_s30 = int_to_ptr.hbm [resolvable:$true] %s213_s30 }
  0xc0   :  { %s185_s18 = sshll.u32 %s1753_s17, 4  ;;  %s1468_s29 = sshra.s32 %s1986_s8, 4  ;;  %s186_s18 = int_to_ptr.vmem [resolvable:$true] %s185_s18  ;;  %s1469_s29 = int_to_ptr.hbm [resolvable:$true] %s1468_s29 }
  0xc1   :  { %s1470_s26 = scalar_lea.hbm %s1469_s29, 128  ;;  %s1472_s28 = scalar_lea.hbm %s1820_s19, 128 }
  0xc2   :  { %p1471_p13 = scmp.ne.s32.totalorder %s1469_s29, %s1470_s26  ;;  %p1473_p0 = scmp.lt.s32.totalorder %s1469_s29, %s1820_s19 }
  0xc3   :  { %p1474_p1 = scmp.lt.s32.totalorder %s1472_s28, %s1470_s26 }
  0xc5   :  { %p1475_p2 = por %p1474_p1, %p1473_p0 }
  0xc7   :  { %p1476_p3 = pnand %p1475_p2, %p1471_p13 }
  0xc9   :  { %1479 = shalt.err (!%p1476_p3)
}
  0xca   :  { %191 = dma.hbm_to_vmem [thread:$0]  %s1986_s8, 2048, %s186_s18, [#allocation15], %s1742_s25, %s1742_s25, %s1743_s2  }
  0xcb   :  { %s243_s22 = sshll.u32 %s1860_s6, 4  ;;  %s1754_s0 = smov [#allocation19]   ;;  %s2006_s22 = int_to_ptr.hbm [resolvable:$true] %s243_s22 }
  0xcc   :  { %s215_s7 = sshll.u32 %s1754_s0, 4  ;;  %s1492_s19 = sshra.s32 %s1996_s30, 4  ;;  %s216_s7 = int_to_ptr.vmem [resolvable:$true] %s215_s7  ;;  %s1493_s19 = int_to_ptr.hbm [resolvable:$true] %s1492_s19 }
  0xcd   :  { %s1494_s5 = scalar_lea.hbm %s1493_s19, 128  ;;  %s1496_s1 = scalar_lea.hbm %s1840_s12, 128 }
  0xce   :  { %p1495_p4 = scmp.ne.s32.totalorder %s1493_s19, %s1494_s5  ;;  %p1497_p5 = scmp.lt.s32.totalorder %s1493_s19, %s1840_s12 }
  0xcf   :  { %p1498_p6 = scmp.lt.s32.totalorder %s1496_s1, %s1494_s5 }
  0xd1   :  { %p1499_p7 = por %p1498_p6, %p1497_p5 }
  0xd3   :  { %p1500_p8 = pnand %p1499_p7, %p1495_p4 }
  0xd5   :  { %1503 = shalt.err (!%p1500_p8)
}
  0xd6   :  { %s2148_s10 = sld [smem:[#allocation54_spill]]  ;;  %s1755_s11 = smov [#allocation22]  }
  0xd7   :  { %221 = dma.hbm_to_vmem [thread:$0]  %s1996_s30, 2048, %s216_s7, [#allocation18], %s1742_s25, %s1742_s25, %s1743_s2  }
  0xd8   :  { %s245_s13 = sshll.u32 %s1755_s11, 4  ;;  %s1516_s12 = sshra.s32 %s2006_s22, 4  ;;  %s246_s13 = int_to_ptr.vmem [resolvable:$true] %s245_s13  ;;  %s1517_s12 = int_to_ptr.hbm [resolvable:$true] %s1516_s12 }
  0xd9   :  { %s1518_s9 = scalar_lea.hbm %s1517_s12, 128  ;;  %s1520_s8 = scalar_lea.hbm %s1860_s6, 128 }
  0xda   :  { %p1519_p9 = scmp.ne.s32.totalorder %s1517_s12, %s1518_s9  ;;  %p1521_p10 = scmp.lt.s32.totalorder %s1517_s12, %s1860_s6 }
  0xdb   :  { %p1522_p11 = scmp.lt.s32.totalorder %s1520_s8, %s1518_s9 }
  0xdc   :  { %s273_s27 = sshll.u32 %s2148_s10, 4  ;;  %s2016_s27 = int_to_ptr.hbm [resolvable:$true] %s273_s27 }
  0xdd   :  { %p1523_p12 = por %p1522_p11, %p1521_p10 }
  0xdf   :  { %p1524_p13 = pnand %p1523_p12, %p1519_p9 }
  0xe1   :  { %1527 = shalt.err (!%p1524_p13)
}
  0xe2   :  { %s2149_s15 = sld [smem:[#allocation56_spill]]  ;;  %s1756_s21 = smov [#allocation25]  }
  0xe3   :  { %251 = dma.hbm_to_vmem [thread:$0]  %s2006_s22, 2048, %s246_s13, [#allocation21], %s1742_s25, %s1742_s25, %s1743_s2  }
  0xe4   :  { %s275_s23 = sshll.u32 %s1756_s21, 4  ;;  %s1540_s6 = sshra.s32 %s2016_s27, 4  ;;  %s276_s23 = int_to_ptr.vmem [resolvable:$true] %s275_s23  ;;  %s1541_s6 = int_to_ptr.hbm [resolvable:$true] %s1540_s6 }
  0xe5   :  { %s1542_s3 = scalar_lea.hbm %s1541_s6, 128  ;;  %s1544_s17 = scalar_lea.hbm %s2148_s10, 128 }
  0xe6   :  { %p1543_p0 = scmp.ne.s32.totalorder %s1541_s6, %s1542_s3  ;;  %p1545_p1 = scmp.lt.s32.totalorder %s1541_s6, %s2148_s10 }
  0xe7   :  { %p1546_p2 = scmp.lt.s32.totalorder %s1544_s17, %s1542_s3 }
  0xe8   :  { %s288_s16 = sshll.u32 %s2149_s15, 4  ;;  %s2026_s16 = int_to_ptr.hbm [resolvable:$true] %s288_s16 }
  0xe9   :  { %p1547_p3 = por %p1546_p2, %p1545_p1 }
  0xeb   :  { %p1548_p4 = pnand %p1547_p3, %p1543_p0 }
  0xed   :  { %1551 = shalt.err (!%p1548_p4)
}
  0xee   :  { %281 = dma.hbm_to_vmem [thread:$0]  %s2016_s27, 2048, %s276_s23, [#allocation24], %s1742_s25, %s1742_s25, %s1743_s2  }
  0xef   :  { %s1757_s18 = smov [#allocation26]   ;;  %s1564_s29 = sshra.s32 %s2026_s16, 4  ;;  %s1565_s29 = int_to_ptr.hbm [resolvable:$true] %s1564_s29 }
  0xf0   :  { %s290_s30 = sshll.u32 %s1757_s18, 4  ;;  %s1566_s26 = scalar_lea.hbm %s1565_s29, 128  ;;  %s291_s30 = int_to_ptr.vmem [resolvable:$true] %s290_s30 }
  0xf1   :  { %p1567_p5 = scmp.ne.s32.totalorder %s1565_s29, %s1566_s26  ;;  %s1568_s28 = scalar_lea.hbm %s2149_s15, 128 }
  0xf2   :  { %p1569_p6 = scmp.lt.s32.totalorder %s1565_s29, %s2149_s15  ;;  %p1570_p7 = scmp.lt.s32.totalorder %s1568_s28, %s1566_s26 }
  0xf4   :  { %p1571_p8 = por %p1570_p7, %p1569_p6 }
  0xf6   :  { %p1572_p9 = pnand %p1571_p8, %p1567_p5 }
  0xf8   :  { %1575 = shalt.err (!%p1572_p9)
}
  0xf9   :  { %296 = dma.hbm_to_vmem [thread:$0]  %s2026_s16, 2048, %s291_s30, [#allocation27], %s1742_s25, %s1742_s25, %s1743_s2  }
  0xfa   :  { %1684 = dma.done.wait [#allocation3], 128  }
  0xfb   :  { %1685 = vsyncadd [#allocation3], 4294967168 }
  0xfc   :  { %1686 = dma.done.wait [#allocation6], 2176  }
  0xfd   :  { %1687 = vsyncadd [#allocation6], 4294965120 }
  0xfe   :  { %1688 = dma.done.wait [#allocation9], 2064  }
  0xff   :  { %1689 = vsyncadd [#allocation9], 4294965232 }
 0x100   :  { %1690 = dma.done.wait [#allocation12], 4112  }
 0x101   :  { %1691 = vsyncadd [#allocation12], 4294963184 }
 0x102   :  { %1692 = dma.done.wait [#allocation15], 4096  }
 0x103   :  { %1693 = vsyncadd [#allocation15], 4294963200 }
 0x104   :  { %1694 = dma.done.wait [#allocation18], 6144  }
 0x105   :  { %1695 = vsyncadd [#allocation18], 4294961152 }
 0x106   :  { %1696 = dma.done.wait [#allocation21], 4096  }
 0x107   :  { %1697 = vsyncadd [#allocation21], 4294963200 }
 0x108   :  { %1698 = dma.done.wait [#allocation24], 4096  }
 0x109   :  { %1699 = vsyncadd [#allocation24], 4294963200 }
 0x10a   :  { %1700 = dma.done.wait [#allocation27], 2048  }
 0x10b   :  { %1701 = vsyncadd [#allocation27], 4294965248  ;;  %v381_v0 = vld [vmem:[#allocation7 + $0x78] sm:$0xff]  ;;  %v380_v1 = vld [vmem:[#allocation7 + $0x70] sm:$0xff]  ;;  %s2150_s25 = sld [smem:[#allocation47_spill]]  ;;  %s1064_s11 = sshll.u32 %s1920_s24, 4  ;;  %s1065_s11 = int_to_ptr.hbm [resolvable:$true] %s1064_s11 }
 0x10c   :  { %386 = vmatpush.msra.mxu0 %v381_v0  ;;  %v379_v2 = vld [vmem:[#allocation7 + $0x68] sm:$0xff]  ;;  %v378_v3 = vld [vmem:[#allocation7 + $0x60] sm:$0xff]  ;;  %v377_v4 = vld [vmem:[#allocation7 + $0x58] sm:$0xff]  ;;  %s2151_s2 = sld [smem:[#allocation48_spill]]  ;;  %s1758_s13 = smov [#allocation32]  }
 0x10d   :  { %v376_v5 = vld [vmem:[#allocation7 + $0x50] sm:$0xff]  ;;  %v375_v6 = vld [vmem:[#allocation7 + $0x48] sm:$0xff]  ;;  %v374_v7 = vld [vmem:[#allocation7 + $0x40] sm:$0xff]  ;;  %s2152_s22 = sld [smem:[#allocation46_spill]]  ;;  %s1062_s27 = sshll.u32 %s1758_s13, 4  ;;  %s1063_s27 = int_to_ptr.vmem [resolvable:$true] %s1062_s27 }
 0x10e   :  { %387 = vmatpush.msra.mxu0 %v380_v1  ;;  %v373_v8 = vld [vmem:[#allocation7 + $0x38] sm:$0xff]  ;;  %v372_v9 = vld [vmem:[#allocation7 + $0x30] sm:$0xff]  ;;  %v371_v10 = vld [vmem:[#allocation7 + $0x28] sm:$0xff]  ;;  %s2153_s0 = sld [smem:[#allocation49_spill]]  ;;  %s1600_s12 = sshra.s32 %s1065_s11, 4  ;;  %s1601_s12 = int_to_ptr.hbm [resolvable:$true] %s1600_s12 }
 0x10f   :  { %v370_v11 = vld [vmem:[#allocation7 + $0x20] sm:$0xff]  ;;  %v369_v12 = vld [vmem:[#allocation7 + $0x18] sm:$0xff]  ;;  %v368_v13 = vld [vmem:[#allocation7 + $0x10] sm:$0xff]  ;;  %s2158_s7 = sld [smem:[#allocation58_spill]]  ;;  %s1602_s9 = scalar_lea.hbm %s1601_s12, 8 }
 0x110   :  { %388 = vmatpush.msra.mxu0 %v379_v2  ;;  %v367_v14 = vld [vmem:[#allocation7 + $0x8] sm:$0xff]  ;;  %v366_v15 = vld [vmem:[#allocation7] sm:$0xff]  ;;  %v365_v16 = vld [vmem:[#allocation2] sm:$0xff]  ;;  %s2159_s19 = sld [smem:[#allocation50_spill]]  ;;  %p1603_p10 = scmp.ne.s32.totalorder %s1601_s12, %s1602_s9 }
 0x111   :  { %v567_v17 = vld [vmem:[#allocation14 + $0x78] sm:$0xff]  ;;  %v566_v18 = vld [vmem:[#allocation14 + $0x70] sm:$0xff]  ;;  %v565_v21 = vld [vmem:[#allocation14 + $0x68] sm:$0xff]  ;;  %s2160_s5 = sld [smem:[#allocation53_spill]]  ;;  %s1604_s8 = scalar_lea.hbm %s1920_s24, 8 }
 0x112   :  { %389 = vmatpush.msra.mxu0 %v378_v3  ;;  %v424_v19 = vld [vmem:[#allocation10 + $0x78] sm:$0xff]  ;;  %v423_v20 = vld [vmem:[#allocation10 + $0x70] sm:$0xff]  ;;  %v422_v22 = vld [vmem:[#allocation10 + $0x68] sm:$0xff]  ;;  %s2161_s1 = sld [smem:[#allocation51_spill]]  ;;  %p1605_p11 = scmp.lt.s32.totalorder %s1601_s12, %s1920_s24 }
 0x113   :  { %429 = vmatpush.msra.mxu1 %v424_v19  ;;  %v564_v23 = vld [vmem:[#allocation14 + $0x60] sm:$0xff]  ;;  %v563_v25 = vld [vmem:[#allocation14 + $0x58] sm:$0xff]  ;;  %v562_v27 = vld [vmem:[#allocation14 + $0x50] sm:$0xff]  ;;  %s2162_s10 = sld [smem:[#allocation55_spill]]  ;;  %p1606_p12 = scmp.lt.s32.totalorder %s1604_s8, %s1602_s9 }
 0x114   :  { %390 = vmatpush.msra.mxu0 %v377_v4  ;;  %v421_v24 = vld [vmem:[#allocation10 + $0x60] sm:$0xff]  ;;  %v420_v26 = vld [vmem:[#allocation10 + $0x58] sm:$0xff]  ;;  %v419_v28 = vld [vmem:[#allocation10 + $0x50] sm:$0xff] }
 0x115   :  { %430 = vmatpush.msra.mxu1 %v423_v20  ;;  %v561_v29 = vld [vmem:[#allocation14 + $0x48] sm:$0xff]  ;;  %v560_v31 = vld [vmem:[#allocation14 + $0x40] sm:$0xff]  ;;  %v559_v33 = vld [vmem:[#allocation14 + $0x38] sm:$0xff]  ;;  %p1607_p13 = por %p1606_p12, %p1605_p11 }
 0x116   :  { %391 = vmatpush.msra.mxu0 %v376_v5  ;;  %v418_v30 = vld [vmem:[#allocation10 + $0x48] sm:$0xff]  ;;  %v417_v32 = vld [vmem:[#allocation10 + $0x40] sm:$0xff]  ;;  %v416_v34 = vld [vmem:[#allocation10 + $0x38] sm:$0xff] }
 0x117   :  { %431 = vmatpush.msra.mxu1 %v422_v22  ;;  %v558_v35 = vld [vmem:[#allocation14 + $0x30] sm:$0xff]  ;;  %v557_v37 = vld [vmem:[#allocation14 + $0x28] sm:$0xff]  ;;  %v556_v39 = vld [vmem:[#allocation14 + $0x20] sm:$0xff]  ;;  %p1608_p0 = pnand %p1607_p13, %p1603_p10 }
 0x118   :  { %392 = vmatpush.msra.mxu0 %v375_v6  ;;  %v415_v36 = vld [vmem:[#allocation10 + $0x30] sm:$0xff]  ;;  %v414_v38 = vld [vmem:[#allocation10 + $0x28] sm:$0xff]  ;;  %v413_v40 = vld [vmem:[#allocation10 + $0x20] sm:$0xff] }
 0x119   :  { %432 = vmatpush.msra.mxu1 %v421_v24  ;;  %v555_v41 = vld [vmem:[#allocation14 + $0x18] sm:$0xff]  ;;  %v554_v43 = vld [vmem:[#allocation14 + $0x10] sm:$0xff]  ;;  %v553_v44 = vld [vmem:[#allocation14 + $0x8] sm:$0xff] }
 0x11a   :  { %393 = vmatpush.msra.mxu0 %v374_v7  ;;  %v412_v42 = vld [vmem:[#allocation10 + $0x18] sm:$0xff]  ;;  %v552_v45 = vld [vmem:[#allocation14] sm:$0xff]  ;;  %v411_v47 = vld [vmem:[#allocation10 + $0x10] sm:$0xff] }
 0x11b   :  { %433 = vmatpush.msra.mxu1 %v420_v26  ;;  %v551_v46 = vld [vmem:[#allocation5] sm:$0xff]  ;;  %v410_v48 = vld [vmem:[#allocation10 + $0x8] sm:$0xff]  ;;  %v409_v49 = vld [vmem:[#allocation10] sm:$0xff] }
 0x11c   :  { %394 = vmatpush.msra.mxu0 %v373_v8  ;;  %v610_v50 = vld [vmem:[#allocation16 + $0x78] sm:$0xff]  ;;  %v609_v51 = vld [vmem:[#allocation16 + $0x70] sm:$0xff]  ;;  %v608_v52 = vld [vmem:[#allocation16 + $0x68] sm:$0xff] }
 0x11d   :  { %434 = vmatpush.msra.mxu1 %v419_v28  ;;  %v607_v53 = vld [vmem:[#allocation16 + $0x60] sm:$0xff]  ;;  %v606_v54 = vld [vmem:[#allocation16 + $0x58] sm:$0xff]  ;;  %v605_v55 = vld [vmem:[#allocation16 + $0x50] sm:$0xff] }
 0x11e   :  { %395 = vmatpush.msra.mxu0 %v372_v9  ;;  %v604_v56 = vld [vmem:[#allocation16 + $0x48] sm:$0xff]  ;;  %v603_v57 = vld [vmem:[#allocation16 + $0x40] sm:$0xff]  ;;  %v602_v58 = vld [vmem:[#allocation16 + $0x38] sm:$0xff] }
 0x11f   :  { %435 = vmatpush.msra.mxu1 %v418_v30  ;;  %v601_v59 = vld [vmem:[#allocation16 + $0x30] sm:$0xff]  ;;  %v600_v60 = vld [vmem:[#allocation16 + $0x28] sm:$0xff]  ;;  %v599_v61 = vld [vmem:[#allocation16 + $0x20] sm:$0xff] }
 0x120   :  { %396 = vmatpush.msra.mxu0 %v371_v10  ;;  %v598_v62 = vld [vmem:[#allocation16 + $0x18] sm:$0xff]  ;;  %v597_v1 = vld [vmem:[#allocation16 + $0x10] sm:$0xff]  ;;  %v596_v3 = vld [vmem:[#allocation16 + $0x8] sm:$0xff] }
 0x121   :  { %436 = vmatpush.msra.mxu1 %v417_v32  ;;  %v1180_v63 = vld [vmem:[#allocation8] ss:$0 sm:$0xff]  ;;  %v595_v5 = vld [vmem:[#allocation16] sm:$0xff]  ;;  %v482_v7 = vld [vmem:[#allocation13 + $0xf0] sm:$0xff] }
 0x122   :  { %397 = vmatpush.msra.mxu0 %v370_v11  ;;  %v483_v8 = vld [vmem:[#allocation13 + $0xf8] sm:$0xff]  ;;  %v480_v9 = vld [vmem:[#allocation13 + $0xe0] sm:$0xff]  ;;  %490 = vmatpush.msra.mxu2 %v482_v7  ;;  %v481_v10 = vld [vmem:[#allocation13 + $0xe8] sm:$0xff] }
 0x123   :  { %437 = vmatpush.msra.mxu1 %v416_v34  ;;  %510 = vmatpush.msra.mxu3 %v483_v8  ;;  %v478_v11 = vld [vmem:[#allocation13 + $0xd0] sm:$0xff]  ;;  %v471_v20 = vld [vmem:[#allocation13 + $0x98] sm:$0xff]  ;;  %v469_v22 = vld [vmem:[#allocation13 + $0x88] sm:$0xff] }
 0x124   :  { %398 = vmatpush.msra.mxu0 %v369_v12  ;;  %v479_v12 = vld [vmem:[#allocation13 + $0xd8] sm:$0xff]  ;;  %491 = vmatpush.msra.mxu2 %v480_v9  ;;  %v470_v19 = vld [vmem:[#allocation13 + $0x90] sm:$0xff]  ;;  %v465_v26 = vld [vmem:[#allocation13 + $0x68] sm:$0xff] }
 0x125   :  { %438 = vmatpush.msra.mxu1 %v415_v36  ;;  %511 = vmatpush.msra.mxu3 %v481_v10  ;;  %v467_v24 = vld [vmem:[#allocation13 + $0x78] sm:$0xff]  ;;  %v461_v30 = vld [vmem:[#allocation13 + $0x48] sm:$0xff]  ;;  %v642_v8 = vld [vmem:[#allocation17 + $0x20] sm:$0xff] }
 0x126   :  { %399 = vmatpush.msra.mxu0 %v368_v13  ;;  %v476_v13 = vld [vmem:[#allocation13 + $0xc0] sm:$0xff]  ;;  %492 = vmatpush.msra.mxu2 %v478_v11  ;;  %v463_v28 = vld [vmem:[#allocation13 + $0x58] sm:$0xff]  ;;  %v643_v9 = vld [vmem:[#allocation17 + $0x28] sm:$0xff] }
 0x127   :  { %439 = vmatpush.msra.mxu1 %v414_v38  ;;  %512 = vmatpush.msra.mxu3 %v479_v12  ;;  %v459_v32 = vld [vmem:[#allocation13 + $0x38] sm:$0xff]  ;;  %v456_v38 = vld [vmem:[#allocation13 + $0x20] sm:$0xff]  ;;  %v640_v11 = vld [vmem:[#allocation17 + $0x10] sm:$0xff] }
 0x128   :  { %400 = vmatpush.msra.mxu0 %v367_v14  ;;  %v477_v14 = vld [vmem:[#allocation13 + $0xc8] sm:$0xff]  ;;  %493 = vmatpush.msra.mxu2 %v476_v13  ;;  %v641_v12 = vld [vmem:[#allocation17 + $0x18] sm:$0xff] }
 0x129   :  { %440 = vmatpush.msra.mxu1 %v413_v40  ;;  %513 = vmatpush.msra.mxu3 %v477_v14  ;;  %v454_v40 = vld [vmem:[#allocation13 + $0x10] sm:$0xff]  ;;  %v638_v14 = vld [vmem:[#allocation17] sm:$0xff] }
 0x12a   :  { %401 = vmatpush.msra.mxu0 %v366_v15  ;;  %v474_v15 = vld [vmem:[#allocation13 + $0xb0] sm:$0xff] }
 0x12b   :  { %402 = vmatmul.f32.vlgmr.msra.gmra.mxu0 %v365_v16  ;;  %441 = vmatpush.msra.mxu1 %v412_v42  ;;  %v475_v16 = vld [vmem:[#allocation13 + $0xb8] sm:$0xff]  ;;  %v452_v42 = vld [vmem:[#allocation13] sm:$0xff] }
 0x12c   :  { %572 = vmatpush.msrb.mxu0 %v567_v17  ;;  %v472_v17 = vld [vmem:[#allocation13 + $0xa0] sm:$0xff]  ;;  %494 = vmatpush.msra.mxu2 %v474_v15  ;;  %v639_v15 = vld [vmem:[#allocation17 + $0x8] sm:$0xff] }
 0x12d   :  { %442 = vmatpush.msra.mxu1 %v411_v47  ;;  %514 = vmatpush.msra.mxu3 %v475_v16  ;;  %v667_v47 = vld [vmem:[#allocation17 + $0xe8] sm:$0xff] }
 0x12e   :  { %573 = vmatpush.msrb.mxu0 %v566_v18  ;;  %v473_v18 = vld [vmem:[#allocation13 + $0xa8] sm:$0xff]  ;;  %495 = vmatpush.msra.mxu2 %v472_v17 }
 0x12f   :  { %443 = vmatpush.msra.mxu1 %v410_v48  ;;  %515 = vmatpush.msra.mxu3 %v473_v18  ;;  %v664_v48 = vld [vmem:[#allocation17 + $0xd0] sm:$0xff]  ;;  %v1183_v17 = vld [vmem:[%s2151_s2] ss:$0 sm:$0xff] }
 0x130   :  { %574 = vmatpush.msrb.mxu0 %v565_v21  ;;  %v468_v21 = vld [vmem:[#allocation13 + $0x80] sm:$0xff]  ;;  %496 = vmatpush.msra.mxu2 %v470_v19 }
 0x131   :  { %444 = vmatpush.msra.mxu1 %v409_v49  ;;  %516 = vmatpush.msra.mxu3 %v471_v20  ;;  %v665_v49 = vld [vmem:[#allocation17 + $0xd8] sm:$0xff] }
 0x132   :  { %575 = vmatpush.msrb.mxu0 %v564_v23  ;;  %v466_v23 = vld [vmem:[#allocation13 + $0x70] sm:$0xff]  ;;  %497 = vmatpush.msra.mxu2 %v468_v21 }
 0x133   :  { %615 = vmatpush.msrb.mxu1 %v610_v50  ;;  %517 = vmatpush.msra.mxu3 %v469_v22  ;;  %v662_v50 = vld [vmem:[#allocation17 + $0xc0] sm:$0xff]  ;;  %v2045_v22 = vld [vmem:[%s2152_s22] sm:$0x3] }
 0x134   :  { %576 = vmatpush.msrb.mxu0 %v563_v25  ;;  %v464_v25 = vld [vmem:[#allocation13 + $0x60] sm:$0xff]  ;;  %498 = vmatpush.msra.mxu2 %v466_v23  ;;  %v487_v23 = vperm.slane %v2045_v22, 1 }
 0x135   :  { %616 = vmatpush.msrb.mxu1 %v609_v51  ;;  %518 = vmatpush.msra.mxu3 %v467_v24  ;;  %v663_v51 = vld [vmem:[#allocation17 + $0xc8] sm:$0xff] }
 0x136   :  { %577 = vmatpush.msrb.mxu0 %v562_v27  ;;  %v462_v27 = vld [vmem:[#allocation13 + $0x50] sm:$0xff]  ;;  %499 = vmatpush.msra.mxu2 %v464_v25 }
 0x137   :  { %617 = vmatpush.msrb.mxu1 %v608_v52  ;;  %519 = vmatpush.msra.mxu3 %v465_v26  ;;  %v660_v52 = vld [vmem:[#allocation17 + $0xb0] sm:$0xff] }
 0x138   :  { %578 = vmatpush.msrb.mxu0 %v561_v29  ;;  %v460_v29 = vld [vmem:[#allocation13 + $0x40] sm:$0xff]  ;;  %500 = vmatpush.msra.mxu2 %v462_v27  ;;  %v785_v27 = vld [vmem:[#allocation19 + $0x78] sm:$0xff] }
 0x139   :  { %618 = vmatpush.msrb.mxu1 %v607_v53  ;;  %520 = vmatpush.msra.mxu3 %v463_v28  ;;  %v661_v53 = vld [vmem:[#allocation17 + $0xb8] sm:$0xff] }
 0x13a   :  { %579 = vmatpush.msrb.mxu0 %v560_v31  ;;  %v458_v31 = vld [vmem:[#allocation13 + $0x30] sm:$0xff]  ;;  %501 = vmatpush.msra.mxu2 %v460_v29  ;;  %v912_v28 = vld [vmem:[#allocation23 + $0x78] sm:$0xff] }
 0x13b   :  { %619 = vmatpush.msrb.mxu1 %v606_v54  ;;  %521 = vmatpush.msra.mxu3 %v461_v30  ;;  %v658_v54 = vld [vmem:[#allocation17 + $0xa0] sm:$0xff]  ;;  %v784_v30 = vld [vmem:[#allocation19 + $0x70] sm:$0xff] }
 0x13c   :  { %580 = vmatpush.msrb.mxu0 %v559_v33  ;;  %v1181_v33 = vld [vmem:[%s2150_s25] ss:$0 sm:$0xff]  ;;  %502 = vmatpush.msra.mxu2 %v458_v31  ;;  %v911_v31 = vld [vmem:[#allocation23 + $0x70] sm:$0xff] }
 0x13d   :  { %620 = vmatpush.msrb.mxu1 %v605_v55  ;;  %522 = vmatpush.msra.mxu3 %v459_v32  ;;  %v659_v55 = vld [vmem:[#allocation17 + $0xa8] sm:$0xff] }
 0x13e   :  { %581 = vmatpush.msrb.mxu0 %v558_v35  ;;  %503 = vmatpush.msra.mxu2 %v456_v38  ;;  %v2049_v32 = vld [vmem:[%s2153_s0] sm:$0x3] }
 0x13f   :  { %621 = vmatpush.msrb.mxu1 %v604_v56  ;;  %v656_v56 = vld [vmem:[#allocation17 + $0x90] sm:$0xff]  ;;  %v673_v38 = vperm.slane %v2049_v32, 1 }
 0x140   :  { %582 = vmatpush.msrb.mxu0 %v557_v37  ;;  %504 = vmatpush.msra.mxu2 %v454_v40  ;;  %v908_v40 = vld [vmem:[#allocation23 + $0x58] sm:$0xff] }
 0x141   :  { %622 = vmatpush.msrb.mxu1 %v603_v57  ;;  %v657_v57 = vld [vmem:[#allocation17 + $0x98] sm:$0xff] }
 0x142   :  { %583 = vmatpush.msrb.mxu0 %v556_v39  ;;  %v457_v39 = vld [vmem:[#allocation13 + $0x28] sm:$0xff]  ;;  %505 = vmatpush.msra.mxu2 %v452_v42  ;;  %v907_v42 = vld [vmem:[#allocation23 + $0x50] sm:$0xff] }
 0x143   :  { %623 = vmatpush.msrb.mxu1 %v602_v58  ;;  %523 = vmatpush.msra.mxu3 %v457_v39  ;;  %v654_v58 = vld [vmem:[#allocation17 + $0x80] sm:$0xff]  ;;  %v781_v39 = vld [vmem:[#allocation19 + $0x58] sm:$0xff] }
 0x144   :  { %584 = vmatpush.msrb.mxu0 %v555_v41  ;;  %v455_v41 = vld [vmem:[#allocation13 + $0x18] sm:$0xff] }
 0x145   :  { %624 = vmatpush.msrb.mxu1 %v601_v59  ;;  %524 = vmatpush.msra.mxu3 %v455_v41  ;;  %v655_v59 = vld [vmem:[#allocation17 + $0x88] sm:$0xff]  ;;  %v780_v41 = vld [vmem:[#allocation19 + $0x50] sm:$0xff] }
 0x146   :  { %585 = vmatpush.msrb.mxu0 %v554_v43  ;;  %v453_v43 = vld [vmem:[#allocation13 + $0x8] sm:$0xff] }
 0x147   :  { %625 = vmatpush.msrb.mxu1 %v600_v60  ;;  %525 = vmatpush.msra.mxu3 %v453_v43  ;;  %v652_v60 = vld [vmem:[#allocation17 + $0x70] sm:$0xff] }
 0x148   :  { %586 = vmatpush.msrb.mxu0 %v553_v44  ;;  %v668_v44 = vld [vmem:[#allocation17 + $0xf0] sm:$0xff] }
 0x149   :  { %626 = vmatpush.msrb.mxu1 %v599_v61  ;;  %676 = vmatpush.msrb.mxu2 %v668_v44  ;;  %v653_v61 = vld [vmem:[#allocation17 + $0x78] sm:$0xff] }
 0x14a   :  { %587 = vmatpush.msrb.mxu0 %v552_v45  ;;  %v669_v45 = vld [vmem:[#allocation17 + $0xf8] sm:$0xff] }
 0x14b   :  { %588 = vmatmul.f32.vlgmr.msrb.gmra.mxu0 %v551_v46  ;;  %627 = vmatpush.msrb.mxu1 %v598_v62  ;;  %v666_v46 = vld [vmem:[#allocation17 + $0xe0] sm:$0xff] }
 0x14c   :  { %696 = vmatpush.msrb.mxu3 %v669_v45  ;;  %677 = vmatpush.msrb.mxu2 %v666_v46  ;;  %v650_v62 = vld [vmem:[#allocation17 + $0x60] sm:$0xff]  ;;  %v779_v45 = vld [vmem:[#allocation19 + $0x48] sm:$0xff] }
 0x14d   :  { %628 = vmatpush.msrb.mxu1 %v597_v1  ;;  %v649_v1 = vld [vmem:[#allocation17 + $0x58] sm:$0xff]  ;;  %790 = vmatpush.msra.mxu0 %v785_v27  ;;  %v906_v46 = vld [vmem:[#allocation23 + $0x48] sm:$0xff] }
 0x14e   :  { %697 = vmatpush.msrb.mxu3 %v667_v47  ;;  %678 = vmatpush.msrb.mxu2 %v664_v48  ;;  %v778_v48 = vld [vmem:[#allocation19 + $0x40] sm:$0xff] }
 0x14f   :  { %629 = vmatpush.msrb.mxu1 %v596_v3  ;;  %v647_v3 = vld [vmem:[#allocation17 + $0x48] sm:$0xff]  ;;  %791 = vmatpush.msra.mxu0 %v784_v30 }
 0x150   :  { %698 = vmatpush.msrb.mxu3 %v665_v49  ;;  %679 = vmatpush.msrb.mxu2 %v662_v50  ;;  %v905_v49 = vld [vmem:[#allocation23 + $0x40] sm:$0xff]  ;;  %v777_v50 = vld [vmem:[#allocation19 + $0x38] sm:$0xff] }
 0x151   :  { %630 = vmatpush.msrb.mxu1 %v595_v5  ;;  %v645_v5 = vld [vmem:[#allocation17 + $0x38] sm:$0xff] }
 0x152   :  { %699 = vmatpush.msrb.mxu3 %v663_v51  ;;  %680 = vmatpush.msrb.mxu2 %v660_v52  ;;  %v904_v51 = vld [vmem:[#allocation23 + $0x38] sm:$0xff] }
 0x154   :  { %700 = vmatpush.msrb.mxu3 %v661_v53  ;;  %681 = vmatpush.msrb.mxu2 %v658_v54  ;;  %v776_v53 = vld [vmem:[#allocation19 + $0x30] sm:$0xff] }
 0x155   :  { %v903_v54 = vld [vmem:[#allocation23 + $0x30] sm:$0xff] }
 0x156   :  { %701 = vmatpush.msrb.mxu3 %v659_v55  ;;  %682 = vmatpush.msrb.mxu2 %v656_v56  ;;  %v775_v56 = vld [vmem:[#allocation19 + $0x28] sm:$0xff] }
 0x158   :  { %702 = vmatpush.msrb.mxu3 %v657_v57  ;;  %683 = vmatpush.msrb.mxu2 %v654_v58  ;;  %v902_v57 = vld [vmem:[#allocation23 + $0x28] sm:$0xff] }
 0x15a   :  { %703 = vmatpush.msrb.mxu3 %v655_v59  ;;  %684 = vmatpush.msrb.mxu2 %v652_v60  ;;  %v774_v59 = vld [vmem:[#allocation19 + $0x20] sm:$0xff] }
 0x15b   :  { %v901_v60 = vld [vmem:[#allocation23 + $0x20] sm:$0xff] }
 0x15c   :  { %704 = vmatpush.msrb.mxu3 %v653_v61  ;;  %685 = vmatpush.msrb.mxu2 %v650_v62 }
 0x1a8   :  { %v403_v0 = vpop.f32.mrf.mxu0 }
 0x1a9   :  { %v404_v2 = vadd.f32 %v1180_v63, %v403_v0  ;;  %v651_v63 = vld [vmem:[#allocation17 + $0x68] sm:$0xff]  ;;  %v648_v0 = vld [vmem:[#allocation17 + $0x50] sm:$0xff] }
 0x1aa   :  { %705 = vmatpush.msrb.mxu3 %v651_v63  ;;  %686 = vmatpush.msrb.mxu2 %v648_v0  ;;  %v773_v63 = vld [vmem:[#allocation19 + $0x18] sm:$0xff] }
 0x1ab   :  { %vm406_vm0 = vcmp.ge.f32.partialorder %v404_v2, 0.0  ;;  %v407_v4 = vmul.f32 0.2, %v404_v2  ;;  %v900_v0 = vld [vmem:[#allocation23 + $0x18] sm:$0xff] }
 0x1ac   :  { %706 = vmatpush.msrb.mxu3 %v649_v1  ;;  %v772_v1 = vld [vmem:[#allocation19 + $0x10] sm:$0xff] }
 0x1ad   :  { %v408_v6 = vsel %vm406_vm0, %v404_v2, %v407_v4  ;;  %v646_v2 = vld [vmem:[#allocation17 + $0x40] sm:$0xff]  ;;  %v644_v4 = vld [vmem:[#allocation17 + $0x30] sm:$0xff] }
 0x1ae   :  { %445 = vmatmul.f32.vlgmr.msra.gmra.mxu1 %v408_v6  ;;  %v1182_v6 = vld [vmem:[#allocation11] ss:$0 sm:$0xff]  ;;  %687 = vmatpush.msrb.mxu2 %v646_v2  ;;  %v899_v2 = vld [vmem:[#allocation23 + $0x10] sm:$0xff] }
 0x1af   :  { %707 = vmatpush.msrb.mxu3 %v647_v3 }
 0x1b0   :  { %688 = vmatpush.msrb.mxu2 %v644_v4  ;;  %v771_v4 = vld [vmem:[#allocation19 + $0x8] sm:$0xff] }
 0x1b1   :  { %708 = vmatpush.msrb.mxu3 %v645_v5  ;;  %v898_v5 = vld [vmem:[#allocation23 + $0x8] sm:$0xff] }
 0x1b2   :  { %689 = vmatpush.msrb.mxu2 %v642_v8 }
 0x1b3   :  { %709 = vmatpush.msrb.mxu3 %v643_v9 }
 0x1b4   :  { %690 = vmatpush.msrb.mxu2 %v640_v11 }
 0x1b5   :  { %710 = vmatpush.msrb.mxu3 %v641_v12 }
 0x1b6   :  { %691 = vmatpush.msrb.mxu2 %v638_v14 }
 0x1b7   :  { %711 = vmatpush.msrb.mxu3 %v639_v15  ;;  %v765_v15 = vld [vmem:[%s2158_s7] sm:$0xff] }
 0x1c8   :  { %v589_v34 = vpop.f32.mrf.mxu0 }
 0x1c9   :  { %v590_v35 = vadd.f32 %v1181_v33, %v589_v34  ;;  %v783_v33 = vld [vmem:[#allocation19 + $0x68] sm:$0xff] }
 0x1ca   :  { %v910_v34 = vld [vmem:[#allocation23 + $0x68] sm:$0xff]  ;;  %792 = vmatpush.msra.mxu0 %v783_v33 }
 0x1cb   :  { %v593_v36 = vmul.f32 0.2, %v590_v35  ;;  %vm592_vm1 = vcmp.ge.f32.partialorder %v590_v35, 0.0 }
 0x1cd   :  { %v594_v37 = vsel %vm592_vm1, %v590_v35, %v593_v36  ;;  %v782_v35 = vld [vmem:[#allocation19 + $0x60] sm:$0xff] }
 0x1ce   :  { %631 = vmatmul.f32.vlgmr.msrb.gmra.mxu1 %v594_v37  ;;  %v909_v37 = vld [vmem:[#allocation23 + $0x60] sm:$0xff]  ;;  %793 = vmatpush.msra.mxu0 %v782_v35 }
 0x1cf   :  { %v952_v35 = vld [vmem:[#allocation25 + $0x60] sm:$0xff] }
 0x1d0   :  { %794 = vmatpush.msra.mxu0 %v781_v39 }
 0x1d2   :  { %795 = vmatpush.msra.mxu0 %v780_v41  ;;  %v823_v41 = vld [vmem:[#allocation20 + $0x50] sm:$0xff] }
 0x1d4   :  { %796 = vmatpush.msra.mxu0 %v779_v45  ;;  %v821_v45 = vld [vmem:[#allocation20 + $0x40] sm:$0xff] }
 0x1d6   :  { %797 = vmatpush.msra.mxu0 %v778_v48 }
 0x1d8   :  { %798 = vmatpush.msra.mxu0 %v777_v50 }
 0x1da   :  { %799 = vmatpush.msra.mxu0 %v776_v53 }
 0x1dc   :  { %800 = vmatpush.msra.mxu0 %v775_v56 }
 0x1de   :  { %801 = vmatpush.msra.mxu0 %v774_v59 }
 0x1e0   :  { %802 = vmatpush.msra.mxu0 %v773_v63 }
 0x1e2   :  { %803 = vmatpush.msra.mxu0 %v772_v1 }
 0x1e4   :  { %804 = vmatpush.msra.mxu0 %v771_v4 }
 0x22b   :  { %v446_v7 = vpop.f32.mrf.mxu1 }
 0x22c   :  { %v447_v10 = vadd.f32 %v1182_v6, %v446_v7  ;;  %v770_v6 = vld [vmem:[#allocation19] sm:$0xff] }
 0x22d   :  { %v897_v7 = vld [vmem:[#allocation23] sm:$0xff]  ;;  %805 = vmatpush.msra.mxu0 %v770_v6 }
 0x22e   :  { %vm449_vm2 = vcmp.ge.f32.partialorder %v447_v10, 0.0  ;;  %v450_v13 = vmul.f32 0.2, %v447_v10 }
 0x230   :  { %v451_v16 = vsel %vm449_vm2, %v447_v10, %v450_v13 }
 0x231   :  { %526 = vmatmul.f32.vlgmr.msra.gmra.mxu3 %v451_v16  ;;  %506 = vmatmul.f32.vlgmr.msra.gmra.mxu2 %v451_v16 }
 0x232   :  { %917 = vmatpush.msra.mxu3 %v912_v28  ;;  %v953_v28 = vld [vmem:[#allocation25 + $0x68] sm:$0xff] }
 0x234   :  { %918 = vmatpush.msra.mxu3 %v911_v31  ;;  %v825_v31 = vld [vmem:[#allocation20 + $0x60] sm:$0xff] }
 0x236   :  { %919 = vmatpush.msra.mxu3 %v910_v34 }
 0x238   :  { %920 = vmatpush.msra.mxu3 %v909_v37 }
 0x23a   :  { %921 = vmatpush.msra.mxu3 %v908_v40  ;;  %v951_v40 = vld [vmem:[#allocation25 + $0x58] sm:$0xff] }
 0x23c   :  { %922 = vmatpush.msra.mxu3 %v907_v42  ;;  %v950_v42 = vld [vmem:[#allocation25 + $0x50] sm:$0xff] }
 0x23e   :  { %923 = vmatpush.msra.mxu3 %v906_v46  ;;  %v672_v46 = vperm.slane %v2049_v32, 0  ;;  %v946_v32 = vld [vmem:[#allocation25 + $0x30] sm:$0xff] }
 0x240   :  { %924 = vmatpush.msra.mxu3 %v905_v49  ;;  %v820_v49 = vld [vmem:[#allocation20 + $0x38] sm:$0xff] }
 0x242   :  { %925 = vmatpush.msra.mxu3 %v904_v51  ;;  %v486_v51 = vperm.slane %v2045_v22, 0 }
 0x244   :  { %926 = vmatpush.msra.mxu3 %v903_v54 }
 0x246   :  { %927 = vmatpush.msra.mxu3 %v902_v57 }
 0x248   :  { %928 = vmatpush.msra.mxu3 %v901_v60  ;;  %v818_v60 = vld [vmem:[#allocation20 + $0x28] sm:$0xff] }
 0x24a   :  { %929 = vmatpush.msra.mxu3 %v900_v0 }
 0x24b   :  { %v632_v18 = vpop.f32.mrf.mxu1 }
 0x24c   :  { %v633_v19 = vadd.f32 %v1183_v17, %v632_v18  ;;  %930 = vmatpush.msra.mxu3 %v899_v2  ;;  %v828_v18 = vld [vmem:[#allocation20 + $0x78] sm:$0xff] }
 0x24d   :  { %833 = vmatpush.msra.mxu1 %v828_v18 }
 0x24e   :  { %v636_v20 = vmul.f32 0.2, %v633_v19  ;;  %vm635_vm3 = vcmp.ge.f32.partialorder %v633_v19, 0.0  ;;  %931 = vmatpush.msra.mxu3 %v898_v5 }
 0x250   :  { %v637_v21 = vsel %vm635_vm3, %v633_v19, %v636_v20  ;;  %932 = vmatpush.msra.mxu3 %v897_v7  ;;  %v827_v19 = vld [vmem:[#allocation20 + $0x70] sm:$0xff] }
 0x251   :  { %692 = vmatmul.f32.vlgmr.msrb.gmra.mxu2 %v637_v21  ;;  %712 = vmatmul.f32.vlgmr.msrb.gmra.mxu3 %v637_v21 }
 0x252   :  { %834 = vmatpush.msra.mxu1 %v827_v19 }
 0x2b4   :  { %v527_v24 = vpop.f32.mrf.mxu3 }
 0x2b5   :  { %v528_v25 = vadd.f32 %v527_v24, %v487_v23  ;;  %v955_v24 = vld [vmem:[#allocation25 + $0x78] sm:$0xff] }
 0x2b6   :  { %960 = vmatpush.msrb.mxu0 %v955_v24  ;;  %v944_v24 = vld [vmem:[#allocation25 + $0x20] sm:$0xff] }
 0x2b7   :  { %v530_v26 = vmul.f32 1.442695, %v528_v25  ;;  %v826_v25 = vld [vmem:[#allocation20 + $0x68] sm:$0xff] }
 0x2b8   :  { %835 = vmatpush.msra.mxu1 %v826_v25  ;;  %v813_v25 = vld [vmem:[#allocation20] sm:$0xff] }
 0x2b9   :  { %1190 = vpow2.f32 %v530_v26  ;;  %v954_v26 = vld [vmem:[#allocation25 + $0x70] sm:$0xff] }
 0x2ba   :  { %961 = vmatpush.msrb.mxu0 %v954_v26  ;;  %836 = vmatpush.msra.mxu1 %v825_v31  ;;  %v943_v26 = vld [vmem:[#allocation25 + $0x18] sm:$0xff]  ;;  %v870_v31 = vld [vmem:[#allocation22 + $0x70] sm:$0xff] }
 0x2bc   :  { %962 = vmatpush.msrb.mxu0 %v953_v28  ;;  %v941_v28 = vld [vmem:[#allocation25 + $0x8] sm:$0xff] }
 0x2be   :  { %963 = vmatpush.msrb.mxu0 %v952_v35  ;;  %v997_v35 = vld [vmem:[#allocation26 + $0x70] sm:$0xff] }
 0x2bf   :  { %v1191_v29 = vpop.eup %1190 }
 0x2c0   :  { %v2051_v36 = vadd.f32 1e-08, %v1191_v29  ;;  %964 = vmatpush.msrb.mxu0 %v951_v40  ;;  %v994_v40 = vld [vmem:[#allocation26 + $0x58] sm:$0xff] }
 0x2c2   :  { %1192 = vrcp.f32 %v2051_v36  ;;  %vm538_vm4 = vweird.f32 %v2051_v36  ;;  %v542_v9 = vand.u32 2147483647, %v2051_v36  ;;  %v544_v10 = vand.u32 2147483648, %v2051_v36  ;;  %965 = vmatpush.msrb.mxu0 %v950_v42  ;;  %v993_v42 = vld [vmem:[#allocation26 + $0x50] sm:$0xff] }
 0x2c4   :  { %vm2069_vm7 = vcmp.eq.f32.partialorder %v542_v9, 8.507059e+37  ;;  %v545_v16 = vor.u32 1.1754944e-38, %v544_v10 }
 0x2c8   :  { %v2055_v52 = vpop.eup %1192 }
 0x2c9   :  { %v534_v55 = vmul.f32 %v2055_v52, %v2051_v36  ;;  %vm539_vm5 = vweird.f32 %v2055_v52  ;;  %v507_v36 = vpop.f32.mrf.mxu2 }
 0x2ca   :  { %vm2065_vm6 = vmor %vm538_vm4, %vm539_vm5 }
 0x2cb   :  { %v535_v62 = vsub.f32 1.0, %v534_v55  ;;  %v819_v55 = vld [vmem:[#allocation20 + $0x30] sm:$0xff] }
 0x2cd   :  { %v536_v3 = vmul.f32 %v2055_v52, %v535_v62  ;;  %v508_v62 = vadd.f32 %v507_v36, %v486_v51  ;;  %v996_v36 = vld [vmem:[#allocation26 + $0x68] sm:$0xff]  ;;  %v989_v51 = vld [vmem:[#allocation26 + $0x30] sm:$0xff] }
 0x2cf   :  { %v537_v11 = vadd.f32 %v2055_v52, %v536_v3  ;;  %v817_v3 = vld [vmem:[#allocation20 + $0x20] sm:$0xff] }
 0x2d1   :  { %v541_v20 = vsel %vm2065_vm6, %v2055_v52, %v537_v11  ;;  %v947_v52 = vld [vmem:[#allocation25 + $0x38] sm:$0xff] }
 0x2d2   :  { %v2078_v29 = vsel %vm2069_vm7, %v545_v16, %v541_v20  ;;  %v815_v20 = vld [vmem:[#allocation20 + $0x10] sm:$0xff] }
 0x2d3   :  { %v548_v33 = vadd.f32 1.0, %v2078_v29  ;;  %v549_v6 = vmul.f32 %v2078_v29, %v508_v62  ;;  %v940_v29 = vld [vmem:[#allocation25] sm:$0xff] }
 0x2d4   :  { %v713_v43 = vpop.f32.mrf.mxu3  ;;  %v693_v48 = vpop.f32.mrf.mxu2 }
 0x2d5   :  { %v714_v44 = vadd.f32 %v713_v43, %v673_v38  ;;  %v824_v38 = vld [vmem:[#allocation20 + $0x58] sm:$0xff]  ;;  %v822_v43 = vld [vmem:[#allocation20 + $0x48] sm:$0xff]  ;;  %v694_v57 = vadd.f32 %v693_v48, %v672_v46  ;;  %v991_v46 = vld [vmem:[#allocation26 + $0x40] sm:$0xff] }
 0x2d6   :  { %837 = vmatpush.msra.mxu1 %v824_v38  ;;  %v995_v38 = vld [vmem:[#allocation26 + $0x60] sm:$0xff]  ;;  %v990_v48 = vld [vmem:[#allocation26 + $0x38] sm:$0xff] }
 0x2d7   :  { %v716_v47 = vmul.f32 1.442695, %v714_v44  ;;  %v949_v44 = vld [vmem:[#allocation25 + $0x48] sm:$0xff] }
 0x2d8   :  { %838 = vmatpush.msra.mxu1 %v823_v41  ;;  %966 = vmatpush.msrb.mxu0 %v949_v44  ;;  %v866_v41 = vld [vmem:[#allocation22 + $0x50] sm:$0xff]  ;;  %v992_v44 = vld [vmem:[#allocation26 + $0x48] sm:$0xff] }
 0x2d9   :  { %1194 = vpow2.f32 %v716_v47  ;;  %v948_v47 = vld [vmem:[#allocation25 + $0x40] sm:$0xff] }
 0x2da   :  { %839 = vmatpush.msra.mxu1 %v822_v43  ;;  %967 = vmatpush.msrb.mxu0 %v948_v47  ;;  %v865_v43 = vld [vmem:[#allocation22 + $0x48] sm:$0xff]  ;;  %v863_v47 = vld [vmem:[#allocation22 + $0x38] sm:$0xff] }
 0x2dc   :  { %840 = vmatpush.msra.mxu1 %v821_v45  ;;  %968 = vmatpush.msrb.mxu0 %v947_v52  ;;  %v864_v45 = vld [vmem:[#allocation22 + $0x40] sm:$0xff]  ;;  %v861_v52 = vld [vmem:[#allocation22 + $0x28] sm:$0xff] }
 0x2de   :  { %841 = vmatpush.msra.mxu1 %v820_v49  ;;  %969 = vmatpush.msrb.mxu0 %v946_v32  ;;  %v862_v49 = vld [vmem:[#allocation22 + $0x30] sm:$0xff] }
 0x2df   :  { %v1195_v58 = vpop.eup %1194 }
 0x2e0   :  { %v718_v61 = vadd.f32 1e-08, %v1195_v58  ;;  %842 = vmatpush.msra.mxu1 %v819_v55 }
 0x2e2   :  { %1196 = vrcp.f32 %v718_v61  ;;  %v730_v17 = vand.u32 2147483648, %v718_v61  ;;  %v728_v23 = vand.u32 2147483647, %v718_v61  ;;  %vm724_vm9 = vweird.f32 %v718_v61  ;;  %843 = vmatpush.msra.mxu1 %v818_v60 }
 0x2e4   :  { %v731_v30 = vor.u32 1.1754944e-38, %v730_v17  ;;  %vm729_vm11 = vcmp.eq.f32.partialorder %v728_v23, 8.507059e+37  ;;  %844 = vmatpush.msra.mxu1 %v817_v3  ;;  %v814_v23 = vld [vmem:[#allocation20 + $0x8] sm:$0xff]  ;;  %v986_v3 = vld [vmem:[#allocation26 + $0x18] sm:$0xff] }
 0x2e8   :  { %v1197_v8 = vpop.eup %1196 }
 0x2e9   :  { %v720_v12 = vmul.f32 %v1197_v8, %v718_v61  ;;  %vm725_vm8 = vweird.f32 %v1197_v8 }
 0x2ea   :  { %vm726_vm10 = vmor %vm724_vm9, %vm725_vm8 }
 0x2eb   :  { %v721_v14 = vsub.f32 1.0, %v720_v12 }
 0x2ed   :  { %v722_v21 = vmul.f32 %v1197_v8, %v721_v14 }
 0x2ef   :  { %v723_v27 = vadd.f32 %v1197_v8, %v722_v21  ;;  %v945_v21 = vld [vmem:[#allocation25 + $0x28] sm:$0xff] }
 0x2f0   :  { %970 = vmatpush.msrb.mxu0 %v945_v21 }
 0x2f1   :  { %v727_v34 = vsel %vm726_vm10, %v1197_v8, %v723_v27  ;;  %v816_v8 = vld [vmem:[#allocation20 + $0x18] sm:$0xff]  ;;  %v942_v27 = vld [vmem:[#allocation25 + $0x10] sm:$0xff] }
 0x2f2   :  { %v732_v37 = vsel %vm729_vm11, %v731_v30, %v727_v34  ;;  %845 = vmatpush.msra.mxu1 %v816_v8  ;;  %971 = vmatpush.msrb.mxu0 %v944_v24  ;;  %v871_v30 = vld [vmem:[#allocation22 + $0x78] sm:$0xff]  ;;  %v869_v34 = vld [vmem:[#allocation22 + $0x68] sm:$0xff] }
 0x2f3   :  { %v2081_v39 = vadd.f32 %v732_v37, %v548_v33  ;;  %v735_v63 = vmul.f32 %v732_v37, %v694_v57  ;;  %876 = vmatpush.msra.mxu2 %v871_v30  ;;  %v998_v33 = vld [vmem:[#allocation26 + $0x78] sm:$0xff]  ;;  %v868_v37 = vld [vmem:[#allocation22 + $0x60] sm:$0xff] }
 0x2f4   :  { %846 = vmatpush.msra.mxu1 %v815_v20  ;;  %972 = vmatpush.msrb.mxu0 %v943_v26 }
 0x2f5   :  { %1198 = vrcp.f32 %v2081_v39  ;;  %v748_v22 = vand.u32 2147483648, %v2081_v39  ;;  %v746_v2 = vand.u32 2147483647, %v2081_v39  ;;  %vm742_vm13 = vweird.f32 %v2081_v39  ;;  %877 = vmatpush.msra.mxu2 %v870_v31 }
 0x2f6   :  { %1200 = vrsqrt.f32 %v2081_v39  ;;  %v736_v11 = vadd.f32 %v735_v63, %v549_v6  ;;  %847 = vmatpush.msra.mxu1 %v814_v23  ;;  %973 = vmatpush.msrb.mxu0 %v942_v27  ;;  %v858_v63 = vld [vmem:[#allocation22 + $0x10] sm:$0xff]  ;;  %v983_v6 = vld [vmem:[#allocation26] sm:$0xff] }
 0x2f7   :  { %1202 = vlog2.f32 %v2081_v39  ;;  %v749_v9 = vor.u32 1.1754944e-38, %v748_v22  ;;  %vm747_vm0 = vcmp.eq.f32.partialorder %v746_v2, 8.507059e+37  ;;  %878 = vmatpush.msra.mxu2 %v869_v34  ;;  %v988_v22 = vld [vmem:[#allocation26 + $0x28] sm:$0xff]  ;;  %v856_v2 = vld [vmem:[#allocation22] sm:$0xff] }
 0x2f8   :  { %848 = vmatpush.msra.mxu1 %v813_v25  ;;  %974 = vmatpush.msrb.mxu0 %v941_v28 }
 0x2f9   :  { %879 = vmatpush.msra.mxu2 %v868_v37 }
 0x2fa   :  { %975 = vmatpush.msrb.mxu0 %v940_v29  ;;  %1003 = vmatpush.msrb.mxu1 %v998_v33 }
 0x2fb   :  { %v1199_v50 = vpop.eup %1198 }
 0x2fc   :  { %v1201_v53 = vpop.eup %1200  ;;  %v738_v54 = vmul.f32 %v1199_v50, %v2081_v39  ;;  %vm743_vm12 = vweird.f32 %v1199_v50  ;;  %1004 = vmatpush.msrb.mxu1 %v997_v35 }
 0x2fd   :  { %v1203_v56 = vpop.eup %1202  ;;  %v756_v58 = vmul.f32 %v1201_v53, %v2081_v39  ;;  %vm744_vm14 = vmor %vm742_vm13, %vm743_vm12  ;;  %vm762_vm15 = vweird.f32 %v1201_v53  ;;  %v867_v39 = vld [vmem:[#allocation22 + $0x58] sm:$0xff] }
 0x2fe   :  { %v739_v59 = vsub.f32 1.0, %v738_v54  ;;  %v753_v61 = vmul.f32 0.6931472, %v1203_v56  ;;  %vm763_vm1 = vmor %vm742_vm13, %vm762_vm15  ;;  %1005 = vmatpush.msrb.mxu1 %v996_v36  ;;  %880 = vmatpush.msra.mxu2 %v867_v39  ;;  %v860_v54 = vld [vmem:[#allocation22 + $0x20] sm:$0xff]  ;;  %v859_v56 = vld [vmem:[#allocation22 + $0x18] sm:$0xff] }
 0x2ff   :  { %v757_v0 = vmul.f32 %v1201_v53, %v756_v58  ;;  %v1185_v58 = vld [vmem:[%s2160_s5] ss:$0 sm:$0xff] }
 0x300   :  { %v740_v1 = vmul.f32 %v1199_v50, %v739_v59  ;;  %v754_v4 = vsub.f32 0.0, %v753_v61  ;;  %1006 = vmatpush.msrb.mxu1 %v995_v38  ;;  %881 = vmatpush.msra.mxu2 %v866_v41 }
 0x301   :  { %v758_v5 = vmul.f32 0.5, %v757_v0  ;;  %v857_v0 = vld [vmem:[#allocation22 + $0x8] sm:$0xff] }
 0x302   :  { %v741_v7 = vadd.f32 %v1199_v50, %v740_v1  ;;  %769 = vst [vmem:[#allocation32] sm:$0xff] %v754_v4  ;;  %1007 = vmatpush.msrb.mxu1 %v994_v40  ;;  %882 = vmatpush.msra.mxu2 %v865_v43  ;;  %v987_v1 = vld [vmem:[#allocation26 + $0x20] sm:$0xff]  ;;  %v985_v4 = vld [vmem:[#allocation26 + $0x10] sm:$0xff] }
 0x303   :  { %v759_v10 = vsub.f32 1.5, %v758_v5  ;;  %v984_v5 = vld [vmem:[#allocation26 + $0x8] sm:$0xff] }
 0x304   :  { %v745_v12 = vsel %vm744_vm14, %v1199_v50, %v741_v7  ;;  %1008 = vmatpush.msrb.mxu1 %v993_v42  ;;  %883 = vmatpush.msra.mxu2 %v864_v45  ;;  %v1184_v50 = vld [vmem:[%s2159_s19] ss:$0 sm:$0xff] }
 0x305   :  { %v750_v13 = vsel %vm747_vm0, %v749_v9, %v745_v12  ;;  %v760_v14 = vmul.f32 %v1201_v53, %v759_v10  ;;  %v1186_v7 = vld [vmem:[%s2161_s1] ss:$0 sm:$0xff] }
 0x306   :  { %v751_v16 = vmul.f32 %v750_v13, %v736_v11  ;;  %1009 = vmatpush.msrb.mxu1 %v992_v44  ;;  %884 = vmatpush.msra.mxu2 %v863_v47  ;;  %v1187_v11 = vld [vmem:[%s2162_s10] ss:$0 sm:$0xff] }
 0x307   :  { %v764_v17 = vsel %vm763_vm1, %v1201_v53, %v760_v14 }
 0x308   :  { %v766_v18 = vmul.f32 %v765_v15, %v764_v17  ;;  %768 = vst [vmem:[#allocation31] sm:$0xff] %v751_v16  ;;  %1010 = vmatpush.msrb.mxu1 %v991_v46  ;;  %885 = vmatpush.msra.mxu2 %v862_v49 }
 0x30a   :  { %v767_v19 = vadd.f32 %v766_v18, %v751_v16  ;;  %1011 = vmatpush.msrb.mxu1 %v990_v48  ;;  %886 = vmatpush.msra.mxu2 %v861_v52 }
 0x30c   :  { %806 = vmatmul.f32.vlgmr.msra.gmra.mxu0 %v767_v19  ;;  %933 = vmatmul.f32.vlgmr.msra.gmra.mxu3 %v767_v19 }
 0x30d   :  { %1012 = vmatpush.msrb.mxu1 %v989_v51  ;;  %887 = vmatpush.msra.mxu2 %v860_v54 }
 0x30f   :  { %888 = vmatpush.msra.mxu2 %v859_v56  ;;  %1013 = vmatpush.msrb.mxu1 %v988_v22 }
 0x311   :  { %889 = vmatpush.msra.mxu2 %v858_v63  ;;  %1014 = vmatpush.msrb.mxu1 %v987_v1 }
 0x313   :  { %890 = vmatpush.msra.mxu2 %v857_v0  ;;  %1015 = vmatpush.msrb.mxu1 %v986_v3 }
 0x315   :  { %891 = vmatpush.msra.mxu2 %v856_v2  ;;  %1016 = vmatpush.msrb.mxu1 %v985_v4 }
 0x317   :  { %1017 = vmatpush.msrb.mxu1 %v984_v5 }
 0x319   :  { %1018 = vmatpush.msrb.mxu1 %v983_v6 }
 0x389   :  { %v807_v53 = vpop.f32.mrf.mxu0 }
 0x38a   :  { %v808_v55 = vadd.f32 %v1184_v50, %v807_v53 }
 0x38c   :  { %vm810_vm2 = vcmp.ge.f32.partialorder %v808_v55, 0.0  ;;  %v811_v57 = vmul.f32 0.2, %v808_v55 }
 0x38e   :  { %v812_v32 = vsel %vm810_vm2, %v808_v55, %v811_v57 }
 0x38f   :  { %849 = vmatmul.f32.vlgmr.msra.gmra.mxu1 %v812_v32  ;;  %v934_v59 = vpop.f32.mrf.mxu3 }
 0x390   :  { %v935_v60 = vadd.f32 %v1185_v58, %v934_v59 }
 0x392   :  { %vm937_vm3 = vcmp.ge.f32.partialorder %v935_v60, 0.0  ;;  %v938_v61 = vmul.f32 0.2, %v935_v60 }
 0x394   :  { %v939_v62 = vsel %vm937_vm3, %v935_v60, %v938_v61 }
 0x395   :  { %976 = vmatmul.f32.vlgmr.msrb.gmra.mxu0 %v939_v62 }
 0x40c   :  { %v850_v8 = vpop.f32.mrf.mxu1 }
 0x40d   :  { %v851_v9 = vadd.f32 %v1186_v7, %v850_v8 }
 0x40f   :  { %vm853_vm4 = vcmp.ge.f32.partialorder %v851_v9, 0.0  ;;  %v854_v10 = vmul.f32 0.2, %v851_v9 }
 0x411   :  { %v855_v12 = vsel %vm853_vm4, %v851_v9, %v854_v10 }
 0x412   :  { %892 = vmatmul.f32.vlgmr.msra.gmra.mxu2 %v855_v12  ;;  %v977_v13 = vpop.f32.mrf.mxu0 }
 0x413   :  { %v978_v14 = vadd.f32 %v1187_v11, %v977_v13 }
 0x415   :  { %vm980_vm5 = vcmp.ge.f32.partialorder %v978_v14, 0.0  ;;  %v981_v15 = vmul.f32 0.2, %v978_v14 }
 0x417   :  { %v982_v16 = vsel %vm980_vm5, %v978_v14, %v981_v15 }
 0x418   :  { %1019 = vmatmul.f32.vlgmr.msrb.gmra.mxu1 %v982_v16 }
 0x419   :  { %1611 = shalt.err (!%p1608_p0)
}
 0x41a   :  { %1067 = dma.vmem_to_hbm [thread:$0]  %s1063_s27, 128, %s1065_s11, [#allocation33]  }
 0x41b   :  { %s2163_s15 = sld [smem:[#allocation52_spill]]  ;;  %s1759_s21 = smov [#allocation28]  }
 0x41c   :  { %s2164_s16 = sld [smem:[#allocation57_spill]]  ;;  %s2108_s23 = sshll.u32 %s1759_s21, 4  ;;  %s1030_s23 = int_to_ptr.vmem [resolvable:$true] %s2108_s23 }
 0x41d   :  { %s1031_s6 = sshll.u32 %s1905_s20, 4  ;;  %s1760_s3 = smov [#allocation29]   ;;  %s1032_s6 = int_to_ptr.hbm [resolvable:$true] %s1031_s6 }
 0x41e   :  { %s2111_s17 = sshll.u32 %s1760_s3, 4  ;;  %s1042_s24 = sshll.u32 %s1910_s14, 4  ;;  %s1041_s17 = int_to_ptr.vmem [resolvable:$true] %s2111_s17  ;;  %s1043_s24 = int_to_ptr.hbm [resolvable:$true] %s1042_s24 }
 0x41f   :  { %s1761_s18 = smov [#allocation31]   ;;  %s1053_s29 = sshll.u32 %s1915_s4, 4  ;;  %s2120_s29 = int_to_ptr.hbm [resolvable:$true] %s1053_s29 }
 0x420   :  { %s2114_s30 = sshll.u32 %s1761_s18, 4  ;;  %s1624_s26 = sshra.s32 %s1032_s6, 4  ;;  %s1052_s30 = int_to_ptr.vmem [resolvable:$true] %s2114_s30  ;;  %s1625_s26 = int_to_ptr.hbm [resolvable:$true] %s1624_s26 }
 0x421   :  { %v1188_v17 = vld [vmem:[%s2163_s15] ss:$0 sm:$0xff]  ;;  %s1626_s28 = scalar_lea.hbm %s1625_s26, 8  ;;  %s1628_s25 = scalar_lea.hbm %s1905_s20, 8 }
 0x422   :  { %v1189_v18 = vld [vmem:[%s2164_s16] ss:$0 sm:$0xff]  ;;  %p1627_p1 = scmp.ne.s32.totalorder %s1625_s26, %s1626_s28  ;;  %p1629_p2 = scmp.lt.s32.totalorder %s1625_s26, %s1905_s20 }
 0x423   :  { %p1630_p3 = scmp.lt.s32.totalorder %s1628_s25, %s1626_s28 }
 0x425   :  { %p1631_p4 = por %p1630_p3, %p1629_p2 }
 0x427   :  { %p1632_p5 = pnand %p1631_p4, %p1627_p1 }
 0x495   :  { %v893_v19 = vpop.f32.mrf.mxu2  ;;  %v1020_v20 = vpop.f32.mrf.mxu1 }
 0x496   :  { %v894_v21 = vadd.f32 %v1188_v17, %v893_v19  ;;  %v1021_v23 = vadd.f32 %v1189_v18, %v1020_v20 }
 0x498   :  { %896 = vst [vmem:[#allocation28] sm:$0xff] %v894_v21 }
 0x499   :  { %1023 = vst [vmem:[#allocation29] sm:$0xff] %v1021_v23 }
 0x49a   :  { %1635 = shalt.err (!%p1632_p5)
}
 0x49b   :  { %1034 = dma.vmem_to_hbm [thread:$0]  %s1030_s23, 128, %s1032_s6, [#allocation4]  }
 0x49c   :  { %s1648_s2 = sshra.s32 %s1043_s24, 4  ;;  %s1652_s0 = scalar_lea.hbm %s1910_s14, 8  ;;  %s1649_s2 = int_to_ptr.hbm [resolvable:$true] %s1648_s2 }
 0x49d   :  { %s1650_s22 = scalar_lea.hbm %s1649_s2, 8  ;;  %p1653_p7 = scmp.lt.s32.totalorder %s1649_s2, %s1910_s14 }
 0x49e   :  { %p1651_p6 = scmp.ne.s32.totalorder %s1649_s2, %s1650_s22  ;;  %p1654_p8 = scmp.lt.s32.totalorder %s1652_s0, %s1650_s22 }
 0x4a0   :  { %p1655_p9 = por %p1654_p8, %p1653_p7 }
 0x4a2   :  { %p1656_p10 = pnand %p1655_p9, %p1651_p6 }
 0x4a4   :  { %1659 = shalt.err (!%p1656_p10)
}
 0x4a5   :  { %1045 = dma.vmem_to_hbm [thread:$0]  %s1041_s17, 128, %s1043_s24, [#allocation30]  }
 0x4a6   :  { %s1672_s20 = sshra.s32 %s2120_s29, 4  ;;  %s1676_s19 = scalar_lea.hbm %s1915_s4, 8  ;;  %s1673_s20 = int_to_ptr.hbm [resolvable:$true] %s1672_s20 }
 0x4a7   :  { %s1674_s7 = scalar_lea.hbm %s1673_s20, 8  ;;  %p1677_p12 = scmp.lt.s32.totalorder %s1673_s20, %s1915_s4 }
 0x4a8   :  { %p1675_p11 = scmp.ne.s32.totalorder %s1673_s20, %s1674_s7  ;;  %p1678_p13 = scmp.lt.s32.totalorder %s1676_s19, %s1674_s7 }
 0x4aa   :  { %p1679_p0 = por %p1678_p13, %p1677_p12 }
 0x4ac   :  { %p1680_p1 = pnand %p1679_p0, %p1675_p11 }
 0x4ae   :  { %1683 = shalt.err (!%p1680_p1)
}
 0x4af   :  { %1056 = dma.vmem_to_hbm [thread:$0]  %s1052_s30, 128, %s2120_s29, [#allocation30]  }
 0x4b0   :  { %1702 = dma.done.wait [#allocation4], 128  }
 0x4b1   :  { %1703 = vsyncadd [#allocation4], 4294967168 }
 0x4b2   :  { %1704 = dma.done.wait [#allocation30], 256  }
 0x4b3   :  { %1705 = vsyncadd [#allocation30], 4294967040 }
 0x4b4   :  { %1706 = dma.done.wait [#allocation33], 128  }
 0x4b5   :  { %1707 = vsyncadd [#allocation33], 4294967168 }
 0x4b6   :  { %1084 = vsyncpa [#allocation3], 1 }
 0x4b7   :  { %1085 = vsyncpa [#allocation6], 1 }
 0x4b8   :  { %1086 = vsyncpa [#allocation9], 1 }
 0x4b9   :  { %1087 = vsyncpa [#allocation12], 1 }
 0x4ba   :  { %1088 = vsyncpa [#allocation15], 1 }
 0x4bb   :  { %1089 = vsyncpa [#allocation18], 1 }
 0x4bc   :  { %1090 = vsyncpa [#allocation21], 1 }
 0x4bd   :  { %1091 = vsyncpa [#allocation24], 1 }
 0x4be   :  { %1092 = vsyncpa [#allocation27], 1 }
 0x4bf   :  { %1093 = vsyncpa [#allocation4], 1 }
 0x4c0   :  { %1094 = vsyncpa [#allocation30], 1 }
 0x4c1   :  { %1095 = vsyncpa [#allocation33], 1 }

</bundles_post_ra>
